<compile_context>
chip_gen: v7x
topology: tpu7x:2x2x1
jax: 0.10.0
libtpu: 0.0.40
codegen_flags: <defaults>
</compile_context>

<pallas_src>
import functools

import jax
import jax.numpy as jnp
from jax.experimental import pallas as pl
from jax.experimental.pallas import tpu as pltpu

LANE = 128
BN_EPS = 1e-5
MXU_DTYPE = jnp.bfloat16        # bf16 LHS/RHS, f32 accumulation


def _round_up(x, m):
    return (x + m - 1) // m * m


def _vmem_capacity_bytes():
    try:
        return int(pltpu.get_tpu_info().vmem_capacity_bytes)
    except Exception:
        return 64 * 1024 * 1024                     # conservative fallback (v7x-sized)


_VMEM_CAP = _vmem_capacity_bytes()
_BIG_VMEM = _VMEM_CAP >= 96 * 1024 * 1024           # v5e / v6e (128 MiB) vs v7x (64 MiB)
CONV_TARGET_ROWS = 1024 if _BIG_VMEM else 512
EW_TARGET_ROWS = 2048 if _BIG_VMEM else 1024
VMEM_LIMIT = min(3 * _VMEM_CAP // 4, 96 * 1024 * 1024)


def _pick_tile_h(h, w, target_rows):
    """Largest divisor th of h with th*w <= target_rows; mildly prefer multiples of 8."""
    best, best8 = 1, 0
    for cand in range(1, h + 1):
        if h % cand == 0 and cand * w <= target_rows:
            best = cand
            if cand % 8 == 0:
                best8 = cand
    return best8 if best8 * 2 >= best else best


def _halo_row_tables(hp, th, tt):
    """Reflected row index of the halo row above / below each H-tile (scalar prefetch)."""
    t = jnp.arange(tt, dtype=jnp.int32)
    up = jnp.abs(t * th - 1)                                   # row -1 reflects to 1
    d = (t + 1) * th
    dn = jnp.minimum(d, 2 * (hp - 1) - d)                      # row hp reflects to hp-2
    return up.astype(jnp.int32), dn.astype(jnp.int32)


# ---------------------------------------------------------------------------
# In-kernel 3x3 conv on a (th+2, wc, cin) row block (reflection along W done here)
# ---------------------------------------------------------------------------
def _conv3x3(rows, w_ref, th, wc):
    # rows: (th+2, wc, cin), already in MXU dtype.  Builds only the 3 dx-shifted
    # copies; dy taps are leading-dim row offsets.  9 accumulated K=cin matmuls.
    cin = rows.shape[-1]
    left = rows[:, 1:2, :]                    # reflected column -1  -> column 1
    right = rows[:, wc - 2:wc - 1, :]         # reflected column wc  -> column wc-2
    shifted = (
        jnp.concatenate([left, rows[:, :wc - 1, :]], axis=1),   # dx = 0
        rows,                                                   # dx = 1 (free)
        jnp.concatenate([rows[:, 1:, :], right], axis=1),       # dx = 2
    )
    acc = None
    for dx in range(3):
        flat = shifted[dx].reshape((th + 2) * wc, cin)
        for dy in range(3):
            tap = flat[dy * wc:(dy + th) * wc, :]
            part = jnp.dot(tap, w_ref[3 * dy + dx],
                           preferred_element_type=jnp.float32)
            acc = part if acc is None else acc + part
    return acc                                # (th*wc, cout_padded) float32


# ---------------------------------------------------------------------------
# Kernels
# ---------------------------------------------------------------------------
def conv1_pool_kernel(up_tbl, dn_tbl, up_ref, x_ref, dn_ref, w_ref,
                      out_ref, sum_ref, sq_ref, *, th, wp, cinp):
    # Fused 2x2 maxpool + reflection-padded 3x3 conv + streamed BN statistics.
    # up_ref / dn_ref are 1-row halo blocks whose index maps already applied the
    # row reflection (via the scalar-prefetch tables), so no boundary logic here.
    del up_tbl, dn_tbl
    pre = jnp.concatenate([up_ref[0], x_ref[0], dn_ref[0]], axis=0)  # (th+2,2,wp,2cinp)
    r = jnp.maximum(pre[:, 0], pre[:, 1])                            # row-pair max
    pooled = jnp.maximum(r[..., :cinp], r[..., cinp:])               # col-pair max
    acc = _conv3x3(pooled.astype(MXU_DTYPE), w_ref, th, wp)          # (th*wp, c1p) f32
    out_ref[0] = acc.reshape(th, wp, -1).astype(out_ref.dtype)       # bf16 lane-dense
    sum_ref[0, 0] = jnp.sum(acc, axis=0, keepdims=True)
    sq_ref[0, 0] = jnp.sum(acc * acc, axis=0, keepdims=True)


def conv2_kernel(up_tbl, dn_tbl, up_ref, x_ref, dn_ref, w_ref, scale_ref, shift_ref,
                 out_ref, sum_ref, sq_ref, *, th, wp):
    # conv1's BN+ReLU fused here (per-channel affine commutes with reflection), then
    # reflection-padded 3x3 conv + streamed BN statistics.
    del up_tbl, dn_tbl
    rows = jnp.concatenate([up_ref[0], x_ref[0], dn_ref[0]], axis=0)  # (th+2,wp,c1p) bf16
    act = jnp.maximum(rows.astype(jnp.float32) * scale_ref[...] + shift_ref[...], 0.0)
    acc = _conv3x3(act.astype(MXU_DTYPE), w_ref, th, wp)
    out_ref[0] = acc.reshape(th, wp, -1).astype(out_ref.dtype)
    sum_ref[0, 0] = jnp.sum(acc, axis=0, keepdims=True)
    sq_ref[0, 0] = jnp.sum(acc * acc, axis=0, keepdims=True)


def bn_relu_kernel(x_ref, scale_ref, shift_ref, o_ref):
    y = x_ref[...].astype(jnp.float32) * scale_ref[...] + shift_ref[...]
    o_ref[...] = jnp.maximum(y, 0.0).astype(o_ref.dtype)


# ---------------------------------------------------------------------------
# pallas_call wrappers
# ---------------------------------------------------------------------------
def _conv1_pool(x5, w1p):
    n, hp, _, wp, c2in = x5.shape
    cinp = c2in // 2
    c1p = w1p.shape[-1]
    th = _pick_tile_h(hp, wp, CONV_TARGET_ROWS)
    tt = hp // th
    up_tbl, dn_tbl = _halo_row_tables(hp, th, tt)
    kernel = functools.partial(conv1_pool_kernel, th=th, wp=wp, cinp=cinp)
    return pl.pallas_call(
        kernel,
        out_shape=(
            jax.ShapeDtypeStruct((n, hp, wp, c1p), jnp.bfloat16),
            jax.ShapeDtypeStruct((n, tt, 1, c1p), jnp.float32),
            jax.ShapeDtypeStruct((n, tt, 1, c1p), jnp.float32),
        ),
        grid_spec=pltpu.PrefetchScalarGridSpec(
            num_scalar_prefetch=2, grid=(n, tt),
            in_specs=[
                pl.BlockSpec((1, 1, 2, wp, 2 * cinp), lambda i, t, ut, dt: (i, ut[t], 0, 0, 0)),
                pl.BlockSpec((1, th, 2, wp, 2 * cinp), lambda i, t, ut, dt: (i, t, 0, 0, 0)),
                pl.BlockSpec((1, 1, 2, wp, 2 * cinp), lambda i, t, ut, dt: (i, dt[t], 0, 0, 0)),
                pl.BlockSpec((9, cinp, c1p), lambda i, t, ut, dt: (0, 0, 0)),
            ],
            out_specs=(
                pl.BlockSpec((1, th, wp, c1p), lambda i, t, ut, dt: (i, t, 0, 0)),
                pl.BlockSpec((1, 1, 1, c1p), lambda i, t, ut, dt: (i, t, 0, 0)),
                pl.BlockSpec((1, 1, 1, c1p), lambda i, t, ut, dt: (i, t, 0, 0)),
            )),
        compiler_params=pltpu.CompilerParams(
            dimension_semantics=("parallel", "parallel"),
            vmem_limit_bytes=VMEM_LIMIT),
    )(up_tbl, dn_tbl, x5, x5, x5, w1p)


def _conv2(c1_raw, w2p, scale1, shift1):
    n, hp, wp, c1p = c1_raw.shape
    c2p = w2p.shape[-1]
    th = _pick_tile_h(hp, wp, CONV_TARGET_ROWS)
    tt = hp // th
    up_tbl, dn_tbl = _halo_row_tables(hp, th, tt)
    kernel = functools.partial(conv2_kernel, th=th, wp=wp)
    return pl.pallas_call(
        kernel,
        out_shape=(
            jax.ShapeDtypeStruct((n, hp, wp, c2p), jnp.bfloat16),
            jax.ShapeDtypeStruct((n, tt, 1, c2p), jnp.float32),
            jax.ShapeDtypeStruct((n, tt, 1, c2p), jnp.float32),
        ),
        grid_spec=pltpu.PrefetchScalarGridSpec(
            num_scalar_prefetch=2, grid=(n, tt),
            in_specs=[
                pl.BlockSpec((1, 1, wp, c1p), lambda i, t, ut, dt: (i, ut[t], 0, 0)),
                pl.BlockSpec((1, th, wp, c1p), lambda i, t, ut, dt: (i, t, 0, 0)),
                pl.BlockSpec((1, 1, wp, c1p), lambda i, t, ut, dt: (i, dt[t], 0, 0)),
                pl.BlockSpec((9, c1p, c2p), lambda i, t, ut, dt: (0, 0, 0)),
                pl.BlockSpec((1, c1p), lambda i, t, ut, dt: (0, 0)),
                pl.BlockSpec((1, c1p), lambda i, t, ut, dt: (0, 0)),
            ],
            out_specs=(
                pl.BlockSpec((1, th, wp, c2p), lambda i, t, ut, dt: (i, t, 0, 0)),
                pl.BlockSpec((1, 1, 1, c2p), lambda i, t, ut, dt: (i, t, 0, 0)),
                pl.BlockSpec((1, 1, 1, c2p), lambda i, t, ut, dt: (i, t, 0, 0)),
            )),
        compiler_params=pltpu.CompilerParams(
            dimension_semantics=("parallel", "parallel"),
            vmem_limit_bytes=VMEM_LIMIT),
    )(up_tbl, dn_tbl, c1_raw, c1_raw, c1_raw, w2p, scale1, shift1)


def _bn_relu(x_raw, scale, shift):
    n, hp, wp, cp = x_raw.shape
    th = _pick_tile_h(hp, wp, EW_TARGET_ROWS)
    return pl.pallas_call(
        bn_relu_kernel,
        out_shape=jax.ShapeDtypeStruct((n, hp, wp, cp), jnp.float32),
        grid=(n, hp // th),
        in_specs=[pl.BlockSpec((1, th, wp, cp), lambda i, t: (i, t, 0, 0)),
                  pl.BlockSpec((1, cp), lambda i, t: (0, 0)),
                  pl.BlockSpec((1, cp), lambda i, t: (0, 0))],
        out_specs=pl.BlockSpec((1, th, wp, cp), lambda i, t: (i, t, 0, 0)),
        compiler_params=pltpu.CompilerParams(
            dimension_semantics=("parallel", "parallel"),
            vmem_limit_bytes=VMEM_LIMIT),
    )(x_raw, scale, shift)


def _bn_scale_shift(sums, sqs, count, gamma, beta, cp):
    # Tiny O(C) fold of batch mean/var (biased, training mode) with gamma/beta.
    # NOTE: E[x^2]-E[x]^2 in f32; fine for O(1) activations (clamped at 0).
    s = jnp.sum(sums[:, :, 0, :], axis=(0, 1))
    q = jnp.sum(sqs[:, :, 0, :], axis=(0, 1))
    mean = s / count
    var = jnp.maximum(q / count - mean * mean, 0.0)
    # gamma/beta zero-padded -> padded lanes get scale=0, shift=0 (stay exactly 0).
    g = jnp.zeros((cp,), jnp.float32).at[:gamma.shape[0]].set(gamma)
    b = jnp.zeros((cp,), jnp.float32).at[:beta.shape[0]].set(beta)
    scale = g * jax.lax.rsqrt(var + BN_EPS)
    shift = b - mean * scale
    return scale.reshape(1, cp), shift.reshape(1, cp)


def down_forward(x_nchw, p):
    out_ch = p["g1"].shape[0]
    cinp = p["w1p"].shape[1]
    c1p = p["w1p"].shape[2]
    c2p = p["w2p"].shape[2]

    x = jnp.transpose(x_nchw, (0, 2, 3, 1)).astype(jnp.float32)       # NCHW -> NHWC
    n, h, w, cin = x.shape
    hp, wp = h // 2, w // 2
    if h % 2 or w % 2:                                                # MaxPool2d floor mode
        x = x[:, :2 * hp, :2 * wp, :]
    if cinp != cin:                                                   # sublane-align Cin
        x = jnp.pad(x, ((0, 0), (0, 0), (0, 0), (0, cinp - cin)))
    count = n * hp * wp
    # Free reshape exposing the 2x2 pool pair axes; the pool itself runs in conv1.
    x5 = x.reshape(n, hp, 2, wp, 2 * cinp)

    # conv1 pass 1: maxpool + conv + streamed stats (raw output kept in bf16).
    c1_raw, s1, q1 = _conv1_pool(x5, p["w1p"])
    scale1, shift1 = _bn_scale_shift(s1, q1, count, p["g1"], p["be1"], c1p)

    # conv2 pass 1: conv1's BN+ReLU fused in, in-kernel reflection (no XLA pad).
    c2_raw, s2, q2 = _conv2(c1_raw, p["w2p"], scale1, shift1)
    scale2, shift2 = _bn_scale_shift(s2, q2, count, p["g2"], p["be2"], c2p)

    y = _bn_relu(c2_raw, scale2, shift2)                              # (N, Hp, Wp, C2P) f32
    y = y[..., :out_ch]                                               # drop lane padding
    return jnp.transpose(y, (0, 3, 1, 2))                             # NHWC -> NCHW


# ---------------------------------------------------------------------------
# Deterministic parameter init (shapes from down(in_ch, out_ch))
# ---------------------------------------------------------------------------
def init_params(key, in_ch, out_ch):
    k1, k2, k3, k4 = jax.random.split(key, 4)
    # HWIO conv weights.  Conv biases are dropped on purpose: a per-channel constant
    # immediately before training-mode BN is cancelled exactly by the mean subtraction.
    w1 = 0.2 * jax.random.normal(k1, (3, 3, in_ch, out_ch), jnp.float32)
    w2 = 0.2 * jax.random.normal(k2, (3, 3, out_ch, out_ch), jnp.float32)
    g1 = 1.0 + 0.1 * jax.random.normal(k3, (out_ch,), jnp.float32)
    g2 = 1.0 + 0.1 * jax.random.normal(k4, (out_ch,), jnp.float32)
    be1 = jnp.zeros((out_ch,), jnp.float32)
    be2 = jnp.zeros((out_ch,), jnp.float32)

    cinp = _round_up(in_ch, 8)          # sublane-align conv1 input channels
    c1p = _round_up(out_ch, LANE)       # lane-dense padded output channels
    c2p = _round_up(out_ch, LANE)
    # (3,3,Cin_p,Cout_p) zero-padded, reshaped to (9, Cin_p, Cout_p), stored bf16
    # for the MXU; row k = dy*3+dx matches the in-kernel tap order.
    w1p = jnp.zeros((3, 3, cinp, c1p), jnp.float32).at[:, :, :in_ch, :out_ch].set(w1)
    w1p = w1p.reshape(9, cinp, c1p).astype(jnp.bfloat16)
    w2p = jnp.zeros((3, 3, c1p, c2p), jnp.float32).at[:, :, :out_ch, :out_ch].set(w2)
    w2p = w2p.reshape(9, c1p, c2p).astype(jnp.bfloat16)
    return dict(w1=w1, w2=w2, w1p=w1p, w2p=w2p, g1=g1, g2=g2, be1=be1, be2=be2)


# ---------------------------------------------------------------------------
# Pure-JAX reference (self-check only)
# ---------------------------------------------------------------------------
def _ref_conv_bn_relu(x, w_hwio, g, be):
    xp = jnp.pad(x, ((0, 0), (1, 1), (1, 1), (0, 0)), mode="reflect")
    y = jax.lax.conv_general_dilated(
        xp, w_hwio, (1, 1), "VALID",
        dimension_numbers=("NHWC", "HWIO", "NHWC"))
    mean = jnp.mean(y, axis=(0, 1, 2), keepdims=True)
    var = jnp.mean((y - mean) ** 2, axis=(0, 1, 2), keepdims=True)
    y = (y - mean) * jax.lax.rsqrt(var + BN_EPS) * g + be
    return jnp.maximum(y, 0.0)


def ref_forward(x_nchw, p):
    x = jnp.transpose(x_nchw, (0, 2, 3, 1))
    n, h, w, c = x.shape
    x = jnp.max(x.reshape(n, h // 2, 2, w // 2, 2, c), axis=(2, 4))
    x = _ref_conv_bn_relu(x, p["w1"], p["g1"], p["be1"])
    x = _ref_conv_bn_relu(x, p["w2"], p["g2"], p["be2"])
    return jnp.transpose(x, (0, 3, 1, 2))


if __name__ == "__main__":
    key = jax.random.PRNGKey(0)
    kx, kp = jax.random.split(key)
    N, in_ch, out_ch, H, W = 2, 4, 8, 16, 16
    x = jax.random.normal(kx, (N, in_ch, H, W), jnp.float32)
    params = init_params(kp, in_ch, out_ch)

    out = jax.block_until_ready(jax.jit(down_forward)(x, params))

    assert out.shape == (N, out_ch, H // 2, W // 2), out.shape
    ref = ref_forward(x, params)
    err = float(jnp.max(jnp.abs(out - ref)))
    # bf16 MXU inputs + bf16 intermediates: tolerance loosened accordingly.
    assert err < 1e-1, f"max abs err {err}"
    print("KERNEL_OK")
</pallas_src>

<mosaic_0001>
module attributes {stable_mosaic.version = 11 : i64} {
  func.func @conv1_pool_kernel(%arg0: i32, %arg1: i32, %arg2: memref<1xi32, #tpu.memory_space<smem>>, %arg3: memref<1xi32, #tpu.memory_space<smem>>, %arg4: memref<1x1x2x8x16xf32, #tpu.memory_space<vmem>>, %arg5: memref<1x8x2x8x16xf32, #tpu.memory_space<vmem>>, %arg6: memref<1x1x2x8x16xf32, #tpu.memory_space<vmem>>, %arg7: memref<9x8x128xbf16, #tpu.memory_space<vmem>>, %arg8: memref<1x8x8x128xbf16, #tpu.memory_space<vmem>>, %arg9: memref<1x1x1x128xf32, #tpu.memory_space<vmem>>, %arg10: memref<1x1x1x128xf32, #tpu.memory_space<vmem>>) attributes {dimension_semantics = [#tpu.dimension_semantics<parallel>, #tpu.dimension_semantics<parallel>], iteration_bounds = array<i64: 2, 1>, scalar_prefetch = 2 : i64, scratch_operands = 0 : i64, tpu.core_type = #tpu.core_type<tc>, window_params = [{transform_indices = @transform_0, window_bounds = array<i64: 1, 1, 2, 8, 16>}, {transform_indices = @transform_1, window_bounds = array<i64: 1, 8, 2, 8, 16>}, {transform_indices = @transform_2, window_bounds = array<i64: 1, 1, 2, 8, 16>}, {pipeline_mode = #tpu.pipeline_mode<synchronous>, transform_indices = @transform_3, window_bounds = array<i64: 9, 8, 128>}, {transform_indices = @transform_4, window_bounds = array<i64: 1, 8, 8, 128>}, {transform_indices = @transform_5, window_bounds = array<i64: 1, 1, 1, 128>}, {transform_indices = @transform_6, window_bounds = array<i64: 1, 1, 1, 128>}]} {
    %c0 = arith.constant 0 : index
    %c0_0 = arith.constant 0 : index
    %c0_1 = arith.constant 0 : index
    %c0_2 = arith.constant 0 : index
    %c0_3 = arith.constant 0 : index
    %0 = vector.load %arg4[%c0, %c0_0, %c0_1, %c0_2, %c0_3] : memref<1x1x2x8x16xf32, #tpu.memory_space<vmem>>, vector<1x1x2x8x16xf32>
    %1 = vector.shape_cast %0 : vector<1x1x2x8x16xf32> to vector<1x2x8x16xf32>
    %c0_4 = arith.constant 0 : index
    %c0_5 = arith.constant 0 : index
    %c0_6 = arith.constant 0 : index
    %c0_7 = arith.constant 0 : index
    %c0_8 = arith.constant 0 : index
    %2 = vector.load %arg5[%c0_4, %c0_5, %c0_6, %c0_7, %c0_8] : memref<1x8x2x8x16xf32, #tpu.memory_space<vmem>>, vector<1x8x2x8x16xf32>
    %3 = vector.shape_cast %2 : vector<1x8x2x8x16xf32> to vector<8x2x8x16xf32>
    %c0_9 = arith.constant 0 : index
    %c0_10 = arith.constant 0 : index
    %c0_11 = arith.constant 0 : index
    %c0_12 = arith.constant 0 : index
    %c0_13 = arith.constant 0 : index
    %4 = vector.load %arg6[%c0_9, %c0_10, %c0_11, %c0_12, %c0_13] : memref<1x1x2x8x16xf32, #tpu.memory_space<vmem>>, vector<1x1x2x8x16xf32>
    %5 = vector.shape_cast %4 : vector<1x1x2x8x16xf32> to vector<1x2x8x16xf32>
    %6 = tpu.concatenate %1, %3, %5 in 0 : vector<1x2x8x16xf32>, vector<8x2x8x16xf32>, vector<1x2x8x16xf32> -> vector<10x2x8x16xf32>
    %7 = vector.extract_strided_slice %6 {offsets = [0, 0, 0, 0], sizes = [10, 1, 8, 16], strides = [1, 1, 1, 1]} : vector<10x2x8x16xf32> to vector<10x1x8x16xf32>
    %8 = vector.shape_cast %7 : vector<10x1x8x16xf32> to vector<10x8x16xf32>
    %9 = vector.extract_strided_slice %6 {offsets = [0, 1, 0, 0], sizes = [10, 1, 8, 16], strides = [1, 1, 1, 1]} : vector<10x2x8x16xf32> to vector<10x1x8x16xf32>
    %10 = vector.shape_cast %9 : vector<10x1x8x16xf32> to vector<10x8x16xf32>
    %11 = arith.maximumf %8, %10 : vector<10x8x16xf32>
    %12 = vector.extract_strided_slice %11 {offsets = [0, 0, 0], sizes = [10, 8, 8], strides = [1, 1, 1]} : vector<10x8x16xf32> to vector<10x8x8xf32>
    %13 = vector.extract_strided_slice %11 {offsets = [0, 0, 8], sizes = [10, 8, 8], strides = [1, 1, 1]} : vector<10x8x16xf32> to vector<10x8x8xf32>
    %14 = arith.maximumf %12, %13 : vector<10x8x8xf32>
    %15 = arith.truncf %14 : vector<10x8x8xf32> to vector<10x8x8xbf16>
    %16 = vector.extract_strided_slice %15 {offsets = [0, 1, 0], sizes = [10, 1, 8], strides = [1, 1, 1]} : vector<10x8x8xbf16> to vector<10x1x8xbf16>
    %17 = vector.extract_strided_slice %15 {offsets = [0, 6, 0], sizes = [10, 1, 8], strides = [1, 1, 1]} : vector<10x8x8xbf16> to vector<10x1x8xbf16>
    %18 = vector.extract_strided_slice %15 {offsets = [0, 0, 0], sizes = [10, 7, 8], strides = [1, 1, 1]} : vector<10x8x8xbf16> to vector<10x7x8xbf16>
    %19 = tpu.concatenate %16, %18 in 1 : vector<10x1x8xbf16>, vector<10x7x8xbf16> -> vector<10x8x8xbf16>
    %20 = vector.extract_strided_slice %15 {offsets = [0, 1, 0], sizes = [10, 7, 8], strides = [1, 1, 1]} : vector<10x8x8xbf16> to vector<10x7x8xbf16>
    %21 = tpu.concatenate %20, %17 in 1 : vector<10x7x8xbf16>, vector<10x1x8xbf16> -> vector<10x8x8xbf16>
    %22 = vector.shape_cast %19 : vector<10x8x8xbf16> to vector<80x8xbf16>
    %23 = vector.extract_strided_slice %22 {offsets = [0, 0], sizes = [64, 8], strides = [1, 1]} : vector<80x8xbf16> to vector<64x8xbf16>
    %c0_14 = arith.constant 0 : index
    %c0_15 = arith.constant 0 : index
    %c0_16 = arith.constant 0 : index
    %24 = vector.load %arg7[%c0_14, %c0_15, %c0_16] : memref<9x8x128xbf16, #tpu.memory_space<vmem>>, vector<1x8x128xbf16>
    %25 = vector.shape_cast %24 : vector<1x8x128xbf16> to vector<8x128xbf16>
    %cst = arith.constant dense<0.000000e+00> : vector<64x128xf32>
    %26 = tpu.matmul %23, %25, %cst {dimension_numbers = #tpu.dot_dimension_numbers<[1], [0], [0], [1], [0, 0, 1, 1], [], []>} : vector<64x8xbf16>, vector<8x128xbf16>, vector<64x128xf32> -> vector<64x128xf32>
    %27 = vector.extract_strided_slice %22 {offsets = [8, 0], sizes = [64, 8], strides = [1, 1]} : vector<80x8xbf16> to vector<64x8xbf16>
    %c3 = arith.constant 3 : index
    %c0_17 = arith.constant 0 : index
    %c0_18 = arith.constant 0 : index
    %28 = vector.load %arg7[%c3, %c0_17, %c0_18] : memref<9x8x128xbf16, #tpu.memory_space<vmem>>, vector<1x8x128xbf16>
    %29 = vector.shape_cast %28 : vector<1x8x128xbf16> to vector<8x128xbf16>
    %cst_19 = arith.constant dense<0.000000e+00> : vector<64x128xf32>
    %30 = tpu.matmul %27, %29, %cst_19 {dimension_numbers = #tpu.dot_dimension_numbers<[1], [0], [0], [1], [0, 0, 1, 1], [], []>} : vector<64x8xbf16>, vector<8x128xbf16>, vector<64x128xf32> -> vector<64x128xf32>
    %31 = arith.addf %26, %30 : vector<64x128xf32>
    %32 = vector.extract_strided_slice %22 {offsets = [16, 0], sizes = [64, 8], strides = [1, 1]} : vector<80x8xbf16> to vector<64x8xbf16>
    %c6 = arith.constant 6 : index
    %c0_20 = arith.constant 0 : index
    %c0_21 = arith.constant 0 : index
    %33 = vector.load %arg7[%c6, %c0_20, %c0_21] : memref<9x8x128xbf16, #tpu.memory_space<vmem>>, vector<1x8x128xbf16>
    %34 = vector.shape_cast %33 : vector<1x8x128xbf16> to vector<8x128xbf16>
    %cst_22 = arith.constant dense<0.000000e+00> : vector<64x128xf32>
    %35 = tpu.matmul %32, %34, %cst_22 {dimension_numbers = #tpu.dot_dimension_numbers<[1], [0], [0], [1], [0, 0, 1, 1], [], []>} : vector<64x8xbf16>, vector<8x128xbf16>, vector<64x128xf32> -> vector<64x128xf32>
    %36 = arith.addf %31, %35 : vector<64x128xf32>
    %37 = vector.shape_cast %15 : vector<10x8x8xbf16> to vector<80x8xbf16>
    %38 = vector.extract_strided_slice %37 {offsets = [0, 0], sizes = [64, 8], strides = [1, 1]} : vector<80x8xbf16> to vector<64x8xbf16>
    %c1 = arith.constant 1 : index
    %c0_23 = arith.constant 0 : index
    %c0_24 = arith.constant 0 : index
    %39 = vector.load %arg7[%c1, %c0_23, %c0_24] : memref<9x8x128xbf16, #tpu.memory_space<vmem>>, vector<1x8x128xbf16>
    %40 = vector.shape_cast %39 : vector<1x8x128xbf16> to vector<8x128xbf16>
    %cst_25 = arith.constant dense<0.000000e+00> : vector<64x128xf32>
    %41 = tpu.matmul %38, %40, %cst_25 {dimension_numbers = #tpu.dot_dimension_numbers<[1], [0], [0], [1], [0, 0, 1, 1], [], []>} : vector<64x8xbf16>, vector<8x128xbf16>, vector<64x128xf32> -> vector<64x128xf32>
    %42 = arith.addf %36, %41 : vector<64x128xf32>
    %43 = vector.extract_strided_slice %37 {offsets = [8, 0], sizes = [64, 8], strides = [1, 1]} : vector<80x8xbf16> to vector<64x8xbf16>
    %c4 = arith.constant 4 : index
    %c0_26 = arith.constant 0 : index
    %c0_27 = arith.constant 0 : index
    %44 = vector.load %arg7[%c4, %c0_26, %c0_27] : memref<9x8x128xbf16, #tpu.memory_space<vmem>>, vector<1x8x128xbf16>
    %45 = vector.shape_cast %44 : vector<1x8x128xbf16> to vector<8x128xbf16>
    %cst_28 = arith.constant dense<0.000000e+00> : vector<64x128xf32>
    %46 = tpu.matmul %43, %45, %cst_28 {dimension_numbers = #tpu.dot_dimension_numbers<[1], [0], [0], [1], [0, 0, 1, 1], [], []>} : vector<64x8xbf16>, vector<8x128xbf16>, vector<64x128xf32> -> vector<64x128xf32>
    %47 = arith.addf %42, %46 : vector<64x128xf32>
    %48 = vector.extract_strided_slice %37 {offsets = [16, 0], sizes = [64, 8], strides = [1, 1]} : vector<80x8xbf16> to vector<64x8xbf16>
    %c7 = arith.constant 7 : index
    %c0_29 = arith.constant 0 : index
    %c0_30 = arith.constant 0 : index
    %49 = vector.load %arg7[%c7, %c0_29, %c0_30] : memref<9x8x128xbf16, #tpu.memory_space<vmem>>, vector<1x8x128xbf16>
    %50 = vector.shape_cast %49 : vector<1x8x128xbf16> to vector<8x128xbf16>
    %cst_31 = arith.constant dense<0.000000e+00> : vector<64x128xf32>
    %51 = tpu.matmul %48, %50, %cst_31 {dimension_numbers = #tpu.dot_dimension_numbers<[1], [0], [0], [1], [0, 0, 1, 1], [], []>} : vector<64x8xbf16>, vector<8x128xbf16>, vector<64x128xf32> -> vector<64x128xf32>
    %52 = arith.addf %47, %51 : vector<64x128xf32>
    %53 = vector.shape_cast %21 : vector<10x8x8xbf16> to vector<80x8xbf16>
    %54 = vector.extract_strided_slice %53 {offsets = [0, 0], sizes = [64, 8], strides = [1, 1]} : vector<80x8xbf16> to vector<64x8xbf16>
    %c2 = arith.constant 2 : index
    %c0_32 = arith.constant 0 : index
    %c0_33 = arith.constant 0 : index
    %55 = vector.load %arg7[%c2, %c0_32, %c0_33] : memref<9x8x128xbf16, #tpu.memory_space<vmem>>, vector<1x8x128xbf16>
    %56 = vector.shape_cast %55 : vector<1x8x128xbf16> to vector<8x128xbf16>
    %cst_34 = arith.constant dense<0.000000e+00> : vector<64x128xf32>
    %57 = tpu.matmul %54, %56, %cst_34 {dimension_numbers = #tpu.dot_dimension_numbers<[1], [0], [0], [1], [0, 0, 1, 1], [], []>} : vector<64x8xbf16>, vector<8x128xbf16>, vector<64x128xf32> -> vector<64x128xf32>
    %58 = arith.addf %52, %57 : vector<64x128xf32>
    %59 = vector.extract_strided_slice %53 {offsets = [8, 0], sizes = [64, 8], strides = [1, 1]} : vector<80x8xbf16> to vector<64x8xbf16>
    %c5 = arith.constant 5 : index
    %c0_35 = arith.constant 0 : index
    %c0_36 = arith.constant 0 : index
    %60 = vector.load %arg7[%c5, %c0_35, %c0_36] : memref<9x8x128xbf16, #tpu.memory_space<vmem>>, vector<1x8x128xbf16>
    %61 = vector.shape_cast %60 : vector<1x8x128xbf16> to vector<8x128xbf16>
    %cst_37 = arith.constant dense<0.000000e+00> : vector<64x128xf32>
    %62 = tpu.matmul %59, %61, %cst_37 {dimension_numbers = #tpu.dot_dimension_numbers<[1], [0], [0], [1], [0, 0, 1, 1], [], []>} : vector<64x8xbf16>, vector<8x128xbf16>, vector<64x128xf32> -> vector<64x128xf32>
    %63 = arith.addf %58, %62 : vector<64x128xf32>
    %64 = vector.extract_strided_slice %53 {offsets = [16, 0], sizes = [64, 8], strides = [1, 1]} : vector<80x8xbf16> to vector<64x8xbf16>
    %c8 = arith.constant 8 : index
    %c0_38 = arith.constant 0 : index
    %c0_39 = arith.constant 0 : index
    %65 = vector.load %arg7[%c8, %c0_38, %c0_39] : memref<9x8x128xbf16, #tpu.memory_space<vmem>>, vector<1x8x128xbf16>
    %66 = vector.shape_cast %65 : vector<1x8x128xbf16> to vector<8x128xbf16>
    %cst_40 = arith.constant dense<0.000000e+00> : vector<64x128xf32>
    %67 = tpu.matmul %64, %66, %cst_40 {dimension_numbers = #tpu.dot_dimension_numbers<[1], [0], [0], [1], [0, 0, 1, 1], [], []>} : vector<64x8xbf16>, vector<8x128xbf16>, vector<64x128xf32> -> vector<64x128xf32>
    %68 = arith.addf %63, %67 : vector<64x128xf32>
    %69 = vector.shape_cast %68 : vector<64x128xf32> to vector<8x8x128xf32>
    %70 = arith.truncf %69 : vector<8x8x128xf32> to vector<8x8x128xbf16>
    %c0_41 = arith.constant 0 : index
    %c0_42 = arith.constant 0 : index
    %c0_43 = arith.constant 0 : index
    %c0_44 = arith.constant 0 : index
    %71 = vector.load %arg8[%c0_41, %c0_42, %c0_43, %c0_44] : memref<1x8x8x128xbf16, #tpu.memory_space<vmem>>, vector<1x8x8x128xbf16>
    %72 = vector.shape_cast %71 : vector<1x8x8x128xbf16> to vector<8x8x128xbf16>
    %73 = vector.shape_cast %70 : vector<8x8x128xbf16> to vector<1x8x8x128xbf16>
    tpu.vector_store %arg8[%c0_41, %c0_42, %c0_43, %c0_44], %73 {strides = array<i32>} : memref<1x8x8x128xbf16, #tpu.memory_space<vmem>>, vector<1x8x8x128xbf16>,
    %cst_45 = arith.constant dense<0.000000e+00> : vector<128xf32>
    %74 = vector.multi_reduction <add>, %68, %cst_45 [0] : vector<64x128xf32> to vector<128xf32>
    %75 = vector.shape_cast %74 : vector<128xf32> to vector<1x128xf32>
    %c0_46 = arith.constant 0 : index
    %c0_47 = arith.constant 0 : index
    %c0_48 = arith.constant 0 : index
    %c0_49 = arith.constant 0 : index
    %76 = vector.load %arg9[%c0_46, %c0_47, %c0_48, %c0_49] : memref<1x1x1x128xf32, #tpu.memory_space<vmem>>, vector<1x1x1x128xf32>
    %77 = vector.shape_cast %76 : vector<1x1x1x128xf32> to vector<1x128xf32>
    %78 = vector.shape_cast %75 : vector<1x128xf32> to vector<1x1x1x128xf32>
    tpu.vector_store %arg9[%c0_46, %c0_47, %c0_48, %c0_49], %78 {strides = array<i32>} : memref<1x1x1x128xf32, #tpu.memory_space<vmem>>, vector<1x1x1x128xf32>,
    %79 = arith.mulf %68, %68 : vector<64x128xf32>
    %cst_50 = arith.constant dense<0.000000e+00> : vector<128xf32>
    %80 = vector.multi_reduction <add>, %79, %cst_50 [0] : vector<64x128xf32> to vector<128xf32>
    %81 = vector.shape_cast %80 : vector<128xf32> to vector<1x128xf32>
    %c0_51 = arith.constant 0 : index
    %c0_52 = arith.constant 0 : index
    %c0_53 = arith.constant 0 : index
    %c0_54 = arith.constant 0 : index
    %82 = vector.load %arg10[%c0_51, %c0_52, %c0_53, %c0_54] : memref<1x1x1x128xf32, #tpu.memory_space<vmem>>, vector<1x1x1x128xf32>
    %83 = vector.shape_cast %82 : vector<1x1x1x128xf32> to vector<1x128xf32>
    %84 = vector.shape_cast %81 : vector<1x128xf32> to vector<1x1x1x128xf32>
    tpu.vector_store %arg10[%c0_51, %c0_52, %c0_53, %c0_54], %84 {strides = array<i32>} : memref<1x1x1x128xf32, #tpu.memory_space<vmem>>, vector<1x1x1x128xf32>,
    return
  }
  func.func @transform_0(%arg0: i32, %arg1: i32, %arg2: memref<1xi32, #tpu.memory_space<smem>>, %arg3: memref<1xi32, #tpu.memory_space<smem>>) -> (i32, i32, i32, i32, i32) {
    %0 = arith.index_cast %arg1 : i32 to index
    %1 = memref.load %arg2[%0] : memref<1xi32, #tpu.memory_space<smem>>
    %c0_i32 = arith.constant 0 : i32
    %c0_i32_0 = arith.constant 0 : i32
    %c0_i32_1 = arith.constant 0 : i32
    %c0_i32_2 = arith.constant 0 : i32
    return %arg0, %1, %c0_i32, %c0_i32_0, %c0_i32_1 : i32, i32, i32, i32, i32
  }
  func.func @transform_1(%arg0: i32, %arg1: i32, %arg2: memref<1xi32, #tpu.memory_space<smem>>, %arg3: memref<1xi32, #tpu.memory_space<smem>>) -> (i32, i32, i32, i32, i32) {
    %c0_i32 = arith.constant 0 : i32
    %c0_i32_0 = arith.constant 0 : i32
    %c0_i32_1 = arith.constant 0 : i32
    %c0_i32_2 = arith.constant 0 : i32
    return %arg0, %arg1, %c0_i32, %c0_i32_0, %c0_i32_1 : i32, i32, i32, i32, i32
  }
  func.func @transform_2(%arg0: i32, %arg1: i32, %arg2: memref<1xi32, #tpu.memory_space<smem>>, %arg3: memref<1xi32, #tpu.memory_space<smem>>) -> (i32, i32, i32, i32, i32) {
    %0 = arith.index_cast %arg1 : i32 to index
    %1 = memref.load %arg3[%0] : memref<1xi32, #tpu.memory_space<smem>>
    %c0_i32 = arith.constant 0 : i32
    %c0_i32_0 = arith.constant 0 : i32
    %c0_i32_1 = arith.constant 0 : i32
    %c0_i32_2 = arith.constant 0 : i32
    return %arg0, %1, %c0_i32, %c0_i32_0, %c0_i32_1 : i32, i32, i32, i32, i32
  }
  func.func @transform_3(%arg0: i32, %arg1: i32, %arg2: memref<1xi32, #tpu.memory_space<smem>>, %arg3: memref<1xi32, #tpu.memory_space<smem>>) -> (i32, i32, i32) {
    %c0_i32 = arith.constant 0 : i32
    %c0_i32_0 = arith.constant 0 : i32
    %c0_i32_1 = arith.constant 0 : i32
    %c0_i32_2 = arith.constant 0 : i32
    return %c0_i32, %c0_i32_0, %c0_i32_1 : i32, i32, i32
  }
  func.func @transform_4(%arg0: i32, %arg1: i32, %arg2: memref<1xi32, #tpu.memory_space<smem>>, %arg3: memref<1xi32, #tpu.memory_space<smem>>) -> (i32, i32, i32, i32) {
    %c0_i32 = arith.constant 0 : i32
    %c0_i32_0 = arith.constant 0 : i32
    %c0_i32_1 = arith.constant 0 : i32
    return %arg0, %arg1, %c0_i32, %c0_i32_0 : i32, i32, i32, i32
  }
  func.func @transform_5(%arg0: i32, %arg1: i32, %arg2: memref<1xi32, #tpu.memory_space<smem>>, %arg3: memref<1xi32, #tpu.memory_space<smem>>) -> (i32, i32, i32, i32) {
    %c0_i32 = arith.constant 0 : i32
    %c0_i32_0 = arith.constant 0 : i32
    %c0_i32_1 = arith.constant 0 : i32
    return %arg0, %arg1, %c0_i32, %c0_i32_0 : i32, i32, i32, i32
  }
  func.func @transform_6(%arg0: i32, %arg1: i32, %arg2: memref<1xi32, #tpu.memory_space<smem>>, %arg3: memref<1xi32, #tpu.memory_space<smem>>) -> (i32, i32, i32, i32) {
    %c0_i32 = arith.constant 0 : i32
    %c0_i32_0 = arith.constant 0 : i32
    %c0_i32_1 = arith.constant 0 : i32
    return %arg0, %arg1, %c0_i32, %c0_i32_0 : i32, i32, i32, i32
  }
}

module attributes {stable_mosaic.version = 11 : i64} {
  func.func @conv2_kernel(%arg0: i32, %arg1: i32, %arg2: memref<1xi32, #tpu.memory_space<smem>>, %arg3: memref<1xi32, #tpu.memory_space<smem>>, %arg4: memref<1x1x8x128xbf16, #tpu.memory_space<vmem>>, %arg5: memref<1x8x8x128xbf16, #tpu.memory_space<vmem>>, %arg6: memref<1x1x8x128xbf16, #tpu.memory_space<vmem>>, %arg7: memref<9x128x128xbf16, #tpu.memory_space<vmem>>, %arg8: memref<1x128xf32, #tpu.memory_space<vmem>>, %arg9: memref<1x128xf32, #tpu.memory_space<vmem>>, %arg10: memref<1x8x8x128xbf16, #tpu.memory_space<vmem>>, %arg11: memref<1x1x1x128xf32, #tpu.memory_space<vmem>>, %arg12: memref<1x1x1x128xf32, #tpu.memory_space<vmem>>) attributes {dimension_semantics = [#tpu.dimension_semantics<parallel>, #tpu.dimension_semantics<parallel>], iteration_bounds = array<i64: 2, 1>, scalar_prefetch = 2 : i64, scratch_operands = 0 : i64, tpu.core_type = #tpu.core_type<tc>, window_params = [{transform_indices = @transform_0, window_bounds = array<i64: 1, 1, 8, 128>}, {transform_indices = @transform_1, window_bounds = array<i64: 1, 8, 8, 128>}, {transform_indices = @transform_2, window_bounds = array<i64: 1, 1, 8, 128>}, {pipeline_mode = #tpu.pipeline_mode<synchronous>, transform_indices = @transform_3, window_bounds = array<i64: 9, 128, 128>}, {pipeline_mode = #tpu.pipeline_mode<synchronous>, transform_indices = @transform_4, window_bounds = array<i64: 1, 128>}, {pipeline_mode = #tpu.pipeline_mode<synchronous>, transform_indices = @transform_5, window_bounds = array<i64: 1, 128>}, {transform_indices = @transform_6, window_bounds = array<i64: 1, 8, 8, 128>}, {transform_indices = @transform_7, window_bounds = array<i64: 1, 1, 1, 128>}, {transform_indices = @transform_8, window_bounds = array<i64: 1, 1, 1, 128>}]} {
    %c0 = arith.constant 0 : index
    %c0_0 = arith.constant 0 : index
    %c0_1 = arith.constant 0 : index
    %c0_2 = arith.constant 0 : index
    %0 = vector.load %arg4[%c0, %c0_0, %c0_1, %c0_2] : memref<1x1x8x128xbf16, #tpu.memory_space<vmem>>, vector<1x1x8x128xbf16>
    %1 = vector.shape_cast %0 : vector<1x1x8x128xbf16> to vector<1x8x128xbf16>
    %c0_3 = arith.constant 0 : index
    %c0_4 = arith.constant 0 : index
    %c0_5 = arith.constant 0 : index
    %c0_6 = arith.constant 0 : index
    %2 = vector.load %arg5[%c0_3, %c0_4, %c0_5, %c0_6] : memref<1x8x8x128xbf16, #tpu.memory_space<vmem>>, vector<1x8x8x128xbf16>
    %3 = vector.shape_cast %2 : vector<1x8x8x128xbf16> to vector<8x8x128xbf16>
    %c0_7 = arith.constant 0 : index
    %c0_8 = arith.constant 0 : index
    %c0_9 = arith.constant 0 : index
    %c0_10 = arith.constant 0 : index
    %4 = vector.load %arg6[%c0_7, %c0_8, %c0_9, %c0_10] : memref<1x1x8x128xbf16, #tpu.memory_space<vmem>>, vector<1x1x8x128xbf16>
    %5 = vector.shape_cast %4 : vector<1x1x8x128xbf16> to vector<1x8x128xbf16>
    %6 = tpu.concatenate %1, %3, %5 in 0 : vector<1x8x128xbf16>, vector<8x8x128xbf16>, vector<1x8x128xbf16> -> vector<10x8x128xbf16>
    %7 = arith.extf %6 : vector<10x8x128xbf16> to vector<10x8x128xf32>
    %c0_11 = arith.constant 0 : index
    %c0_12 = arith.constant 0 : index
    %8 = vector.load %arg8[%c0_11, %c0_12] : memref<1x128xf32, #tpu.memory_space<vmem>>, vector<1x128xf32>
    %9 = vector.shape_cast %8 : vector<1x128xf32> to vector<1x1x128xf32>
    %10 = vector.broadcast %9 : vector<1x1x128xf32> to vector<10x8x128xf32>
    %11 = arith.mulf %7, %10 : vector<10x8x128xf32>
    %c0_13 = arith.constant 0 : index
    %c0_14 = arith.constant 0 : index
    %12 = vector.load %arg9[%c0_13, %c0_14] : memref<1x128xf32, #tpu.memory_space<vmem>>, vector<1x128xf32>
    %13 = vector.shape_cast %12 : vector<1x128xf32> to vector<1x1x128xf32>
    %14 = vector.broadcast %13 : vector<1x1x128xf32> to vector<10x8x128xf32>
    %15 = arith.addf %11, %14 : vector<10x8x128xf32>
    %cst = arith.constant 0.000000e+00 : f32
    %16 = vector.broadcast %cst : f32 to vector<10x8x128xf32>
    %17 = arith.maximumf %15, %16 : vector<10x8x128xf32>
    %18 = arith.truncf %17 : vector<10x8x128xf32> to vector<10x8x128xbf16>
    %19 = vector.extract_strided_slice %18 {offsets = [0, 1, 0], sizes = [10, 1, 128], strides = [1, 1, 1]} : vector<10x8x128xbf16> to vector<10x1x128xbf16>
    %20 = vector.extract_strided_slice %18 {offsets = [0, 6, 0], sizes = [10, 1, 128], strides = [1, 1, 1]} : vector<10x8x128xbf16> to vector<10x1x128xbf16>
    %21 = vector.extract_strided_slice %18 {offsets = [0, 0, 0], sizes = [10, 7, 128], strides = [1, 1, 1]} : vector<10x8x128xbf16> to vector<10x7x128xbf16>
    %22 = tpu.concatenate %19, %21 in 1 : vector<10x1x128xbf16>, vector<10x7x128xbf16> -> vector<10x8x128xbf16>
    %23 = vector.extract_strided_slice %18 {offsets = [0, 1, 0], sizes = [10, 7, 128], strides = [1, 1, 1]} : vector<10x8x128xbf16> to vector<10x7x128xbf16>
    %24 = tpu.concatenate %23, %20 in 1 : vector<10x7x128xbf16>, vector<10x1x128xbf16> -> vector<10x8x128xbf16>
    %25 = vector.shape_cast %22 : vector<10x8x128xbf16> to vector<80x128xbf16>
    %26 = vector.extract_strided_slice %25 {offsets = [0, 0], sizes = [64, 128], strides = [1, 1]} : vector<80x128xbf16> to vector<64x128xbf16>
    %c0_15 = arith.constant 0 : index
    %c0_16 = arith.constant 0 : index
    %c0_17 = arith.constant 0 : index
    %27 = vector.load %arg7[%c0_15, %c0_16, %c0_17] : memref<9x128x128xbf16, #tpu.memory_space<vmem>>, vector<1x128x128xbf16>
    %28 = vector.shape_cast %27 : vector<1x128x128xbf16> to vector<128x128xbf16>
    %cst_18 = arith.constant dense<0.000000e+00> : vector<64x128xf32>
    %29 = tpu.matmul %26, %28, %cst_18 {dimension_numbers = #tpu.dot_dimension_numbers<[1], [0], [0], [1], [0, 0, 1, 1], [], []>} : vector<64x128xbf16>, vector<128x128xbf16>, vector<64x128xf32> -> vector<64x128xf32>
    %30 = vector.extract_strided_slice %25 {offsets = [8, 0], sizes = [64, 128], strides = [1, 1]} : vector<80x128xbf16> to vector<64x128xbf16>
    %c3 = arith.constant 3 : index
    %c0_19 = arith.constant 0 : index
    %c0_20 = arith.constant 0 : index
    %31 = vector.load %arg7[%c3, %c0_19, %c0_20] : memref<9x128x128xbf16, #tpu.memory_space<vmem>>, vector<1x128x128xbf16>
    %32 = vector.shape_cast %31 : vector<1x128x128xbf16> to vector<128x128xbf16>
    %cst_21 = arith.constant dense<0.000000e+00> : vector<64x128xf32>
    %33 = tpu.matmul %30, %32, %cst_21 {dimension_numbers = #tpu.dot_dimension_numbers<[1], [0], [0], [1], [0, 0, 1, 1], [], []>} : vector<64x128xbf16>, vector<128x128xbf16>, vector<64x128xf32> -> vector<64x128xf32>
    %34 = arith.addf %29, %33 : vector<64x128xf32>
    %35 = vector.extract_strided_slice %25 {offsets = [16, 0], sizes = [64, 128], strides = [1, 1]} : vector<80x128xbf16> to vector<64x128xbf16>
    %c6 = arith.constant 6 : index
    %c0_22 = arith.constant 0 : index
    %c0_23 = arith.constant 0 : index
    %36 = vector.load %arg7[%c6, %c0_22, %c0_23] : memref<9x128x128xbf16, #tpu.memory_space<vmem>>, vector<1x128x128xbf16>
    %37 = vector.shape_cast %36 : vector<1x128x128xbf16> to vector<128x128xbf16>
    %cst_24 = arith.constant dense<0.000000e+00> : vector<64x128xf32>
    %38 = tpu.matmul %35, %37, %cst_24 {dimension_numbers = #tpu.dot_dimension_numbers<[1], [0], [0], [1], [0, 0, 1, 1], [], []>} : vector<64x128xbf16>, vector<128x128xbf16>, vector<64x128xf32> -> vector<64x128xf32>
    %39 = arith.addf %34, %38 : vector<64x128xf32>
    %40 = vector.shape_cast %18 : vector<10x8x128xbf16> to vector<80x128xbf16>
    %41 = vector.extract_strided_slice %40 {offsets = [0, 0], sizes = [64, 128], strides = [1, 1]} : vector<80x128xbf16> to vector<64x128xbf16>
    %c1 = arith.constant 1 : index
    %c0_25 = arith.constant 0 : index
    %c0_26 = arith.constant 0 : index
    %42 = vector.load %arg7[%c1, %c0_25, %c0_26] : memref<9x128x128xbf16, #tpu.memory_space<vmem>>, vector<1x128x128xbf16>
    %43 = vector.shape_cast %42 : vector<1x128x128xbf16> to vector<128x128xbf16>
    %cst_27 = arith.constant dense<0.000000e+00> : vector<64x128xf32>
    %44 = tpu.matmul %41, %43, %cst_27 {dimension_numbers = #tpu.dot_dimension_numbers<[1], [0], [0], [1], [0, 0, 1, 1], [], []>} : vector<64x128xbf16>, vector<128x128xbf16>, vector<64x128xf32> -> vector<64x128xf32>
    %45 = arith.addf %39, %44 : vector<64x128xf32>
    %46 = vector.extract_strided_slice %40 {offsets = [8, 0], sizes = [64, 128], strides = [1, 1]} : vector<80x128xbf16> to vector<64x128xbf16>
    %c4 = arith.constant 4 : index
    %c0_28 = arith.constant 0 : index
    %c0_29 = arith.constant 0 : index
    %47 = vector.load %arg7[%c4, %c0_28, %c0_29] : memref<9x128x128xbf16, #tpu.memory_space<vmem>>, vector<1x128x128xbf16>
    %48 = vector.shape_cast %47 : vector<1x128x128xbf16> to vector<128x128xbf16>
    %cst_30 = arith.constant dense<0.000000e+00> : vector<64x128xf32>
    %49 = tpu.matmul %46, %48, %cst_30 {dimension_numbers = #tpu.dot_dimension_numbers<[1], [0], [0], [1], [0, 0, 1, 1], [], []>} : vector<64x128xbf16>, vector<128x128xbf16>, vector<64x128xf32> -> vector<64x128xf32>
    %50 = arith.addf %45, %49 : vector<64x128xf32>
    %51 = vector.extract_strided_slice %40 {offsets = [16, 0], sizes = [64, 128], strides = [1, 1]} : vector<80x128xbf16> to vector<64x128xbf16>
    %c7 = arith.constant 7 : index
    %c0_31 = arith.constant 0 : index
    %c0_32 = arith.constant 0 : index
    %52 = vector.load %arg7[%c7, %c0_31, %c0_32] : memref<9x128x128xbf16, #tpu.memory_space<vmem>>, vector<1x128x128xbf16>
    %53 = vector.shape_cast %52 : vector<1x128x128xbf16> to vector<128x128xbf16>
    %cst_33 = arith.constant dense<0.000000e+00> : vector<64x128xf32>
    %54 = tpu.matmul %51, %53, %cst_33 {dimension_numbers = #tpu.dot_dimension_numbers<[1], [0], [0], [1], [0, 0, 1, 1], [], []>} : vector<64x128xbf16>, vector<128x128xbf16>, vector<64x128xf32> -> vector<64x128xf32>
    %55 = arith.addf %50, %54 : vector<64x128xf32>
    %56 = vector.shape_cast %24 : vector<10x8x128xbf16> to vector<80x128xbf16>
    %57 = vector.extract_strided_slice %56 {offsets = [0, 0], sizes = [64, 128], strides = [1, 1]} : vector<80x128xbf16> to vector<64x128xbf16>
    %c2 = arith.constant 2 : index
    %c0_34 = arith.constant 0 : index
    %c0_35 = arith.constant 0 : index
    %58 = vector.load %arg7[%c2, %c0_34, %c0_35] : memref<9x128x128xbf16, #tpu.memory_space<vmem>>, vector<1x128x128xbf16>
    %59 = vector.shape_cast %58 : vector<1x128x128xbf16> to vector<128x128xbf16>
    %cst_36 = arith.constant dense<0.000000e+00> : vector<64x128xf32>
    %60 = tpu.matmul %57, %59, %cst_36 {dimension_numbers = #tpu.dot_dimension_numbers<[1], [0], [0], [1], [0, 0, 1, 1], [], []>} : vector<64x128xbf16>, vector<128x128xbf16>, vector<64x128xf32> -> vector<64x128xf32>
    %61 = arith.addf %55, %60 : vector<64x128xf32>
    %62 = vector.extract_strided_slice %56 {offsets = [8, 0], sizes = [64, 128], strides = [1, 1]} : vector<80x128xbf16> to vector<64x128xbf16>
    %c5 = arith.constant 5 : index
    %c0_37 = arith.constant 0 : index
    %c0_38 = arith.constant 0 : index
    %63 = vector.load %arg7[%c5, %c0_37, %c0_38] : memref<9x128x128xbf16, #tpu.memory_space<vmem>>, vector<1x128x128xbf16>
    %64 = vector.shape_cast %63 : vector<1x128x128xbf16> to vector<128x128xbf16>
    %cst_39 = arith.constant dense<0.000000e+00> : vector<64x128xf32>
    %65 = tpu.matmul %62, %64, %cst_39 {dimension_numbers = #tpu.dot_dimension_numbers<[1], [0], [0], [1], [0, 0, 1, 1], [], []>} : vector<64x128xbf16>, vector<128x128xbf16>, vector<64x128xf32> -> vector<64x128xf32>
    %66 = arith.addf %61, %65 : vector<64x128xf32>
    %67 = vector.extract_strided_slice %56 {offsets = [16, 0], sizes = [64, 128], strides = [1, 1]} : vector<80x128xbf16> to vector<64x128xbf16>
    %c8 = arith.constant 8 : index
    %c0_40 = arith.constant 0 : index
    %c0_41 = arith.constant 0 : index
    %68 = vector.load %arg7[%c8, %c0_40, %c0_41] : memref<9x128x128xbf16, #tpu.memory_space<vmem>>, vector<1x128x128xbf16>
    %69 = vector.shape_cast %68 : vector<1x128x128xbf16> to vector<128x128xbf16>
    %cst_42 = arith.constant dense<0.000000e+00> : vector<64x128xf32>
    %70 = tpu.matmul %67, %69, %cst_42 {dimension_numbers = #tpu.dot_dimension_numbers<[1], [0], [0], [1], [0, 0, 1, 1], [], []>} : vector<64x128xbf16>, vector<128x128xbf16>, vector<64x128xf32> -> vector<64x128xf32>
    %71 = arith.addf %66, %70 : vector<64x128xf32>
    %72 = vector.shape_cast %71 : vector<64x128xf32> to vector<8x8x128xf32>
    %73 = arith.truncf %72 : vector<8x8x128xf32> to vector<8x8x128xbf16>
    %c0_43 = arith.constant 0 : index
    %c0_44 = arith.constant 0 : index
    %c0_45 = arith.constant 0 : index
    %c0_46 = arith.constant 0 : index
    %74 = vector.load %arg10[%c0_43, %c0_44, %c0_45, %c0_46] : memref<1x8x8x128xbf16, #tpu.memory_space<vmem>>, vector<1x8x8x128xbf16>
    %75 = vector.shape_cast %74 : vector<1x8x8x128xbf16> to vector<8x8x128xbf16>
    %76 = vector.shape_cast %73 : vector<8x8x128xbf16> to vector<1x8x8x128xbf16>
    tpu.vector_store %arg10[%c0_43, %c0_44, %c0_45, %c0_46], %76 {strides = array<i32>} : memref<1x8x8x128xbf16, #tpu.memory_space<vmem>>, vector<1x8x8x128xbf16>,
    %cst_47 = arith.constant dense<0.000000e+00> : vector<128xf32>
    %77 = vector.multi_reduction <add>, %71, %cst_47 [0] : vector<64x128xf32> to vector<128xf32>
    %78 = vector.shape_cast %77 : vector<128xf32> to vector<1x128xf32>
    %c0_48 = arith.constant 0 : index
    %c0_49 = arith.constant 0 : index
    %c0_50 = arith.constant 0 : index
    %c0_51 = arith.constant 0 : index
    %79 = vector.load %arg11[%c0_48, %c0_49, %c0_50, %c0_51] : memref<1x1x1x128xf32, #tpu.memory_space<vmem>>, vector<1x1x1x128xf32>
    %80 = vector.shape_cast %79 : vector<1x1x1x128xf32> to vector<1x128xf32>
    %81 = vector.shape_cast %78 : vector<1x128xf32> to vector<1x1x1x128xf32>
    tpu.vector_store %arg11[%c0_48, %c0_49, %c0_50, %c0_51], %81 {strides = array<i32>} : memref<1x1x1x128xf32, #tpu.memory_space<vmem>>, vector<1x1x1x128xf32>,
    %82 = arith.mulf %71, %71 : vector<64x128xf32>
    %cst_52 = arith.constant dense<0.000000e+00> : vector<128xf32>
    %83 = vector.multi_reduction <add>, %82, %cst_52 [0] : vector<64x128xf32> to vector<128xf32>
    %84 = vector.shape_cast %83 : vector<128xf32> to vector<1x128xf32>
    %c0_53 = arith.constant 0 : index
    %c0_54 = arith.constant 0 : index
    %c0_55 = arith.constant 0 : index
    %c0_56 = arith.constant 0 : index
    %85 = vector.load %arg12[%c0_53, %c0_54, %c0_55, %c0_56] : memref<1x1x1x128xf32, #tpu.memory_space<vmem>>, vector<1x1x1x128xf32>
    %86 = vector.shape_cast %85 : vector<1x1x1x128xf32> to vector<1x128xf32>
    %87 = vector.shape_cast %84 : vector<1x128xf32> to vector<1x1x1x128xf32>
    tpu.vector_store %arg12[%c0_53, %c0_54, %c0_55, %c0_56], %87 {strides = array<i32>} : memref<1x1x1x128xf32, #tpu.memory_space<vmem>>, vector<1x1x1x128xf32>,
    return
  }
  func.func @transform_0(%arg0: i32, %arg1: i32, %arg2: memref<1xi32, #tpu.memory_space<smem>>, %arg3: memref<1xi32, #tpu.memory_space<smem>>) -> (i32, i32, i32, i32) {
    %0 = arith.index_cast %arg1 : i32 to index
    %1 = memref.load %arg2[%0] : memref<1xi32, #tpu.memory_space<smem>>
    %c0_i32 = arith.constant 0 : i32
    %c0_i32_0 = arith.constant 0 : i32
    %c0_i32_1 = arith.constant 0 : i32
    return %arg0, %1, %c0_i32, %c0_i32_0 : i32, i32, i32, i32
  }
  func.func @transform_1(%arg0: i32, %arg1: i32, %arg2: memref<1xi32, #tpu.memory_space<smem>>, %arg3: memref<1xi32, #tpu.memory_space<smem>>) -> (i32, i32, i32, i32) {
    %c0_i32 = arith.constant 0 : i32
    %c0_i32_0 = arith.constant 0 : i32
    %c0_i32_1 = arith.constant 0 : i32
    return %arg0, %arg1, %c0_i32, %c0_i32_0 : i32, i32, i32, i32
  }
  func.func @transform_2(%arg0: i32, %arg1: i32, %arg2: memref<1xi32, #tpu.memory_space<smem>>, %arg3: memref<1xi32, #tpu.memory_space<smem>>) -> (i32, i32, i32, i32) {
    %0 = arith.index_cast %arg1 : i32 to index
    %1 = memref.load %arg3[%0] : memref<1xi32, #tpu.memory_space<smem>>
    %c0_i32 = arith.constant 0 : i32
    %c0_i32_0 = arith.constant 0 : i32
    %c0_i32_1 = arith.constant 0 : i32
    return %arg0, %1, %c0_i32, %c0_i32_0 : i32, i32, i32, i32
  }
  func.func @transform_3(%arg0: i32, %arg1: i32, %arg2: memref<1xi32, #tpu.memory_space<smem>>, %arg3: memref<1xi32, #tpu.memory_space<smem>>) -> (i32, i32, i32) {
    %c0_i32 = arith.constant 0 : i32
    %c0_i32_0 = arith.constant 0 : i32
    %c0_i32_1 = arith.constant 0 : i32
    %c0_i32_2 = arith.constant 0 : i32
    return %c0_i32, %c0_i32_0, %c0_i32_1 : i32, i32, i32
  }
  func.func @transform_4(%arg0: i32, %arg1: i32, %arg2: memref<1xi32, #tpu.memory_space<smem>>, %arg3: memref<1xi32, #tpu.memory_space<smem>>) -> (i32, i32) {
    %c0_i32 = arith.constant 0 : i32
    %c0_i32_0 = arith.constant 0 : i32
    %c0_i32_1 = arith.constant 0 : i32
    return %c0_i32, %c0_i32_0 : i32, i32
  }
  func.func @transform_5(%arg0: i32, %arg1: i32, %arg2: memref<1xi32, #tpu.memory_space<smem>>, %arg3: memref<1xi32, #tpu.memory_space<smem>>) -> (i32, i32) {
    %c0_i32 = arith.constant 0 : i32
    %c0_i32_0 = arith.constant 0 : i32
    %c0_i32_1 = arith.constant 0 : i32
    return %c0_i32, %c0_i32_0 : i32, i32
  }
  func.func @transform_6(%arg0: i32, %arg1: i32, %arg2: memref<1xi32, #tpu.memory_space<smem>>, %arg3: memref<1xi32, #tpu.memory_space<smem>>) -> (i32, i32, i32, i32) {
    %c0_i32 = arith.constant 0 : i32
    %c0_i32_0 = arith.constant 0 : i32
    %c0_i32_1 = arith.constant 0 : i32
    return %arg0, %arg1, %c0_i32, %c0_i32_0 : i32, i32, i32, i32
  }
  func.func @transform_7(%arg0: i32, %arg1: i32, %arg2: memref<1xi32, #tpu.memory_space<smem>>, %arg3: memref<1xi32, #tpu.memory_space<smem>>) -> (i32, i32, i32, i32) {
    %c0_i32 = arith.constant 0 : i32
    %c0_i32_0 = arith.constant 0 : i32
    %c0_i32_1 = arith.constant 0 : i32
    return %arg0, %arg1, %c0_i32, %c0_i32_0 : i32, i32, i32, i32
  }
  func.func @transform_8(%arg0: i32, %arg1: i32, %arg2: memref<1xi32, #tpu.memory_space<smem>>, %arg3: memref<1xi32, #tpu.memory_space<smem>>) -> (i32, i32, i32, i32) {
    %c0_i32 = arith.constant 0 : i32
    %c0_i32_0 = arith.constant 0 : i32
    %c0_i32_1 = arith.constant 0 : i32
    return %arg0, %arg1, %c0_i32, %c0_i32_0 : i32, i32, i32, i32
  }
}

module attributes {stable_mosaic.version = 11 : i64} {
  func.func @bn_relu_kernel(%arg0: i32, %arg1: i32, %arg2: memref<1x8x8x128xbf16, #tpu.memory_space<vmem>>, %arg3: memref<1x128xf32, #tpu.memory_space<vmem>>, %arg4: memref<1x128xf32, #tpu.memory_space<vmem>>, %arg5: memref<1x8x8x128xf32, #tpu.memory_space<vmem>>) attributes {dimension_semantics = [#tpu.dimension_semantics<parallel>, #tpu.dimension_semantics<parallel>], iteration_bounds = array<i64: 2, 1>, scalar_prefetch = 0 : i64, scratch_operands = 0 : i64, tpu.core_type = #tpu.core_type<tc>, window_params = [{transform_indices = @transform_0, window_bounds = array<i64: 1, 8, 8, 128>}, {pipeline_mode = #tpu.pipeline_mode<synchronous>, transform_indices = @transform_1, window_bounds = array<i64: 1, 128>}, {pipeline_mode = #tpu.pipeline_mode<synchronous>, transform_indices = @transform_2, window_bounds = array<i64: 1, 128>}, {transform_indices = @transform_3, window_bounds = array<i64: 1, 8, 8, 128>}]} {
    %c0 = arith.constant 0 : index
    %c0_0 = arith.constant 0 : index
    %c0_1 = arith.constant 0 : index
    %c0_2 = arith.constant 0 : index
    %0 = vector.load %arg2[%c0, %c0_0, %c0_1, %c0_2] : memref<1x8x8x128xbf16, #tpu.memory_space<vmem>>, vector<1x8x8x128xbf16>
    %1 = arith.extf %0 : vector<1x8x8x128xbf16> to vector<1x8x8x128xf32>
    %c0_3 = arith.constant 0 : index
    %c0_4 = arith.constant 0 : index
    %2 = vector.load %arg3[%c0_3, %c0_4] : memref<1x128xf32, #tpu.memory_space<vmem>>, vector<1x128xf32>
    %3 = vector.shape_cast %2 : vector<1x128xf32> to vector<1x1x1x128xf32>
    %4 = vector.broadcast %3 : vector<1x1x1x128xf32> to vector<1x8x8x128xf32>
    %5 = arith.mulf %1, %4 : vector<1x8x8x128xf32>
    %c0_5 = arith.constant 0 : index
    %c0_6 = arith.constant 0 : index
    %6 = vector.load %arg4[%c0_5, %c0_6] : memref<1x128xf32, #tpu.memory_space<vmem>>, vector<1x128xf32>
    %7 = vector.shape_cast %6 : vector<1x128xf32> to vector<1x1x1x128xf32>
    %8 = vector.broadcast %7 : vector<1x1x1x128xf32> to vector<1x8x8x128xf32>
    %9 = arith.addf %5, %8 : vector<1x8x8x128xf32>
    %cst = arith.constant 0.000000e+00 : f32
    %10 = vector.broadcast %cst : f32 to vector<1x8x8x128xf32>
    %11 = arith.maximumf %9, %10 : vector<1x8x8x128xf32>
    %c0_7 = arith.constant 0 : index
    %c0_8 = arith.constant 0 : index
    %c0_9 = arith.constant 0 : index
    %c0_10 = arith.constant 0 : index
    %12 = vector.load %arg5[%c0_7, %c0_8, %c0_9, %c0_10] : memref<1x8x8x128xf32, #tpu.memory_space<vmem>>, vector<1x8x8x128xf32>
    tpu.vector_store %arg5[%c0_7, %c0_8, %c0_9, %c0_10], %11 {strides = array<i32>} : memref<1x8x8x128xf32, #tpu.memory_space<vmem>>, vector<1x8x8x128xf32>,
    return
  }
  func.func @transform_0(%arg0: i32, %arg1: i32) -> (i32, i32, i32, i32) {
    %c0_i32 = arith.constant 0 : i32
    %c0_i32_0 = arith.constant 0 : i32
    %c0_i32_1 = arith.constant 0 : i32
    return %arg0, %arg1, %c0_i32, %c0_i32_0 : i32, i32, i32, i32
  }
  func.func @transform_1(%arg0: i32, %arg1: i32) -> (i32, i32) {
    %c0_i32 = arith.constant 0 : i32
    %c0_i32_0 = arith.constant 0 : i32
    %c0_i32_1 = arith.constant 0 : i32
    return %c0_i32, %c0_i32_0 : i32, i32
  }
  func.func @transform_2(%arg0: i32, %arg1: i32) -> (i32, i32) {
    %c0_i32 = arith.constant 0 : i32
    %c0_i32_0 = arith.constant 0 : i32
    %c0_i32_1 = arith.constant 0 : i32
    return %c0_i32, %c0_i32_0 : i32, i32
  }
  func.func @transform_3(%arg0: i32, %arg1: i32) -> (i32, i32, i32, i32) {
    %c0_i32 = arith.constant 0 : i32
    %c0_i32_0 = arith.constant 0 : i32
    %c0_i32_1 = arith.constant 0 : i32
    return %arg0, %arg1, %c0_i32, %c0_i32_0 : i32, i32, i32, i32
  }
}

</mosaic_0001>

<bundles_post_ra>
// kernel: down_forward.5
= control target key start
LH: loop header
LB: loop body
LE: loop exit
PB: predicated region body
PF: predicated region fallthrough
CT: control target
= control target key end

     0   :  { %s461_s12 = smov 0   ;;  %s463_s13 = smov 0   ;;  %s504_s0 = inlined_call_operand.vmem [shape: bf16[2,8,8,128], index: 0, kind: input, shape index: {}]   ;;  %s505_s1 = inlined_call_operand.vmem [shape: f32[1,128], index: 1, kind: input, shape index: {}]   ;;  %s506_s2 = inlined_call_operand.vmem [shape: f32[1,128], index: 2, kind: input, shape index: {}]   ;;  %s507_s3 = inlined_call_operand.vmem [shape: f32[2,8,8,128], index: 3, kind: output, shape index: {}]  }
   0x1   :  { %s465_s14 = smov 0  }
   0x2 LB: > { %s25_s15 = sadd.s32 1, %s435_s13  ;;  %p363_p0 = scmp.ge.s32.totalorder %s439_s14, 1  ;;  %s439_s14 = sphi %s465_s14, %s13_s14   ;;  %s435_s13 = sphi %s463_s13, %s509_s13   ;;  %s431_s12 = sphi %s461_s12, %s508_s12  }
   0x3   : > { %p27_p1 = scmp.ge.s32.totalorder %s25_s15, 2  ;;  %p158_p2 = scmp.lt.s32.totalorder %s439_s14, 3 }
   0x5   : > { %s511_s15 = smov (%p27_p1, %s25_s15), 0  ;;  %p159_p3 = pnand %p363_p0, %p158_p2 }
   0x6   : > { %p191_p4 = scmp.lt.s32.totalorder (!%p159_p3), %s431_s12, 1  ;;  %v368_v0 = vld [vmem:[%s505_s1] ss:$0 sm:$0xff] (!%p159_p3) }
   0x7   : > { %162 = sbr.rel (%p159_p3) target bundleno = 30 (0x1e), region = 32  ;;  %v369_v9 = vld [vmem:[%s506_s2] ss:$0 sm:$0xff] (!%p159_p3) }
   0xe   : > { %s513_s12 = smov (!%p191_p4, %s431_s12), 1 }
   0xf   : > { %s372_s16 = sshll.u32 %s513_s12, 5  ;;  %s373_s24 = sshll.u32 %s513_s12, 6 }
  0x10   : > { %s198_s19 = scalar_lea.vmem %s504_s0, %s372_s16  ;;  %s208_s27 = scalar_lea.vmem %s507_s3, %s373_s24 }
  0x11   : > { %v375_v1 = vld [vmem:[%s198_s19] sm:$0xff]   ;;  %v390_v2 = vld [vmem:[%s198_s19 + $0x8] sm:$0xff]   ;;  %v391_v3 = vld [vmem:[%s198_s19 + $0x10] sm:$0xff]  }
  0x12   : > { %v376_v4 = vunpack.c.l.bf16 %v375_v1  ;;  %v377_v5 = vunpack.c.h.bf16 %v375_v1  ;;  %v380_v6 = vunpack.c.l.bf16 %v390_v2  ;;  %v381_v7 = vunpack.c.h.bf16 %v390_v2  ;;  %v392_v8 = vld [vmem:[%s198_s19 + $0x18] sm:$0xff]  }
  0x13   : > { %v384_v10 = vunpack.c.l.bf16 %v391_v3  ;;  %v385_v11 = vunpack.c.h.bf16 %v391_v3  ;;  %v388_v12 = vunpack.c.l.bf16 %v392_v8  ;;  %v389_v13 = vunpack.c.h.bf16 %v392_v8 }
  0x14   : > { %v233_v14 = vmul.f32 %v376_v4, %v368_v0  ;;  %v234_v15 = vmul.f32 %v377_v5, %v368_v0  ;;  %v235_v16 = vmul.f32 %v380_v6, %v368_v0  ;;  %v236_v17 = vmul.f32 %v381_v7, %v368_v0 }
  0x15   : > { %v237_v18 = vmul.f32 %v384_v10, %v368_v0  ;;  %v238_v19 = vmul.f32 %v385_v11, %v368_v0  ;;  %v239_v20 = vmul.f32 %v388_v12, %v368_v0  ;;  %v240_v21 = vmul.f32 %v389_v13, %v368_v0 }
  0x16   : > { %v248_v22 = vadd.f32 %v369_v9, %v233_v14  ;;  %v249_v23 = vadd.f32 %v369_v9, %v234_v15  ;;  %v250_v24 = vadd.f32 %v369_v9, %v235_v16  ;;  %v251_v25 = vadd.f32 %v369_v9, %v236_v17 }
  0x17   : > { %v252_v26 = vadd.f32 %v369_v9, %v237_v18  ;;  %v253_v27 = vadd.f32 %v369_v9, %v238_v19  ;;  %v254_v28 = vadd.f32 %v369_v9, %v239_v20  ;;  %v255_v29 = vadd.f32 %v369_v9, %v240_v21 }
  0x18   : > { %v256_v30 = vmax.f32 %v248_v22, 0.0  ;;  %v257_v31 = vmax.f32 %v249_v23, 0.0  ;;  %v258_v32 = vmax.f32 %v250_v24, 0.0  ;;  %v259_v33 = vmax.f32 %v251_v25, 0.0 }
  0x19   : > { %v260_v34 = vmax.f32 %v252_v26, 0.0  ;;  %v261_v35 = vmax.f32 %v253_v27, 0.0  ;;  %v262_v36 = vmax.f32 %v254_v28, 0.0  ;;  %v263_v37 = vmax.f32 %v255_v29, 0.0 }
  0x1a   : > { %264 = vst [vmem:[%s208_s27] sm:$0xff] %v256_v30  ;;  %265 = vst [vmem:[%s208_s27 + $0x8] sm:$0xff] %v257_v31 }
  0x1b   : > { %266 = vst [vmem:[%s208_s27 + $0x10] sm:$0xff] %v258_v32  ;;  %267 = vst [vmem:[%s208_s27 + $0x18] sm:$0xff] %v259_v33 }
  0x1c   : > { %268 = vst [vmem:[%s208_s27 + $0x20] sm:$0xff] %v260_v34  ;;  %269 = vst [vmem:[%s208_s27 + $0x28] sm:$0xff] %v261_v35 }
  0x1d   : > { %270 = vst [vmem:[%s208_s27 + $0x30] sm:$0xff] %v262_v36  ;;  %271 = vst [vmem:[%s208_s27 + $0x38] sm:$0xff] %v263_v37 }
  0x1e PF: > { %s13_s14 = sadd.s32 1, %s439_s14   ;;  %s508_s12 = smov %s435_s13 }
  0x1f   : > { %p10_p5 = scmp.ge.s32.totalorder %s13_s14, 4   ;;  %s509_s13 = smov %s511_s15 }
  0x21   :  { %12 = sbr.rel (!%p10_p5) target bundleno = 2 (0x2), region = 62 }

// kernel: down_forward.3
= control target key start
LH: loop header
LB: loop body
LE: loop exit
PB: predicated region body
PF: predicated region fallthrough
CT: control target
= control target key end

     0   :  { %s2223_s9 = smov 0   ;;  %s2225_s10 = smov 0   ;;  %s2622_s0 = inlined_call_operand.<no memory space> [shape: s32[1], index: 0, kind: input, shape index: {}]   ;;  %s2623_s1 = inlined_call_operand.<no memory space> [shape: s32[1], index: 1, kind: input, shape index: {}]   ;;  %s2624_s2 = inlined_call_operand.vmem [shape: f32[2,8,2,8,16], index: 2, kind: input, shape index: {}, may-alias: {2,3,4}]   ;;  %s2625_s3 = inlined_call_operand.vmem [shape: f32[2,8,2,8,16], index: 3, kind: input, shape index: {}, may-alias: {2,3,4}]   ;;  %s2626_s4 = inlined_call_operand.vmem [shape: f32[2,8,2,8,16], index: 4, kind: input, shape index: {}, may-alias: {2,3,4}]   ;;  %s2627_s5 = inlined_call_operand.vmem [shape: bf16[9,8,128], index: 5, kind: input, shape index: {}]   ;;  %s2628_s6 = inlined_call_operand.vmem [shape: bf16[2,8,8,128], index: 6, kind: output, shape index: {0}]   ;;  %s2629_s7 = inlined_call_operand.vmem [shape: f32[2,1,1,128], index: 7, kind: output, shape index: {1}]   ;;  %s2630_s8 = inlined_call_operand.vmem [shape: f32[2,1,1,128], index: 8, kind: output, shape index: {2}]  }
   0x1   :  { %14 = sst [smem:[#allocation3]] %s2622_s0  ;;  %s2227_s11 = smov 0  }
   0x2   :  { %15 = sst [smem:[#allocation4]] %s2623_s1 }
   0x3 LB: > { %s33_s0 = sadd.s32 1, %s2165_s10  ;;  %p1773_p0 = scmp.ge.s32.totalorder %s2169_s11, 1  ;;  %s2169_s11 = sphi %s2227_s11, %s21_s11   ;;  %s2165_s10 = sphi %s2225_s10, %s2636_s10   ;;  %s2161_s9 = sphi %s2223_s9, %s2635_s9  }
   0x4   : > { %p35_p1 = scmp.ge.s32.totalorder %s33_s0, 2  ;;  %p287_p2 = scmp.lt.s32.totalorder %s2169_s11, 3 }
   0x6   : > { %s2638_s0 = smov (%p35_p1, %s33_s0), 0  ;;  %p288_p3 = pnand %p1773_p0, %p287_p2 }
   0x7   : > { %p359_p4 = scmp.lt.s32.totalorder (!%p288_p3), %s2161_s9, 1  ;;  %s358_s1 = sld [smem:[#allocation3]] (!%p288_p3)  ;;  %vm647_vm0 = vcmask (!%p288_p3), 1043456   ;;  %v2269_v25 = vld [vmem:[%s2627_s5 + $0x10] sm:$0xf] (!%p288_p3)  ;;  %vm683_vm1 = vcmask (!%p288_p3), 64512  }
   0x8   : > { %291 = sbr.rel (%p288_p3) target bundleno = 466 (0x1d2), region = 36  ;;  %s2241_s12 = sld [smem:[#allocation4]] (!%p288_p3)  ;;  %2096 = vmatprep.subr.msk.bf16.mxu0 (!%p288_p3), %vm647_vm0, %v2269_v25  ;;  %v2277_v28 = vsel (!%p288_p3), %vm647_vm0, %v2269_v25, 0  ;;  %v1784_v36 = vld [vmem:[%s2627_s5 + $0xc] sm:$0xf] (!%p288_p3)  ;;  %vm594_vm2 = vcmask (!%p288_p3), 1040384  }
   0x9   : > { %s2171_s21 = smov (!%p288_p3), 120   ;;  %1977 = vmatpush3.bf16.msra.mxu0 (!%p288_p3), %v2277_v28  ;;  %2092 = vmatprep.subr.msk.bf16.mxu1 (!%p288_p3), %vm647_vm0, %v1784_v36  ;;  %v698_v37 = vsel (!%p288_p3), %vm647_vm0, %v1784_v36, 0  ;;  %v2299_v38 = vld [vmem:[%s2627_s5] sm:$0xf] (!%p288_p3)  ;;  %v1825_v39 = vld [vmem:[%s2627_s5 + $0x1c] sm:$0xf] (!%p288_p3) }
   0xa   : > { %1937 = vmatpush3.bf16.msra.mxu1 (!%p288_p3), %v698_v37  ;;  %2098 = vmatprep.subr.msk.bf16.mxu0 (!%p288_p3), %vm647_vm0, %v1825_v39  ;;  %vm595_vm3 = vsmask.f32 (!%p288_p3), 256  ;;  %vm648_vm5 = vsmask.f32 (!%p288_p3), 3328 }
   0xb   : > { %2093 = vmatprep.subr.msk.bf16.mxu1 (!%p288_p3), %vm647_vm0, %v2299_v38  ;;  %vm2391_vm4 = vmand (!%p288_p3), %vm594_vm2, %vm595_vm3 }
   0xc   : > { %vm2481_vm6 = vmand (!%p288_p3), %vm647_vm0, %vm648_vm5 }
   0xd   : > { %p361_p5 = scmp.lt.s32.totalorder (!%p288_p3), %s358_s1, 7 }
   0xe   : > { %p383_p6 = scmp.lt.s32.totalorder (!%p288_p3), %s2241_s12, 7 }
   0xf   : > { %s2640_s9 = smov (!%p359_p4, %s2161_s9), 1  ;;  %s2642_s1 = smov (!%p361_p5, %s358_s1), 7 }
  0x10   : > { %s1857_s13 = sshll.u32 %s2640_s9, 7  ;;  %s1775_s17 = sshll.u32 %s2640_s9, 4 }
  0x11   : > { %s378_s16 = scalar_lea.vmem %s2625_s3, %s1857_s13  ;;  %s2644_s12 = smov (!%p383_p6, %s2241_s12), 7 }
  0x12   : > { %v424_v0 = vld [vmem:[%s378_s16 + $0x40] sm:$0xff]  ;;  %v425_v1 = vld [vmem:[%s378_s16 + $0x48] sm:$0xff]  ;;  %v426_v2 = vld [vmem:[%s378_s16 + $0x50] sm:$0xff]  ;;  %s1774_s18 = sshll.u32 %s2642_s1, 1  ;;  %s1779_s23 = sshll.u32 %s2644_s12, 1 }
  0x13   : > { %v427_v3 = vld [vmem:[%s378_s16 + $0x58] sm:$0xff]  ;;  %v2249_v4 = vmax.f32 %v424_v0, %v425_v1  ;;  %v416_v5 = vld [vmem:[%s378_s16] sm:$0xff]  ;;  %v417_v6 = vld [vmem:[%s378_s16 + $0x8] sm:$0xff]  ;;  %s365_s22 = sadd.s32 %s1775_s17, %s1774_s18  ;;  %s387_s25 = sadd.s32 %s1779_s23, %s1775_s17 }
  0x14   : > { %v2252_v7 = vmax.f32 %v426_v2, %v427_v3  ;;  %v418_v8 = vld [vmem:[%s378_s16 + $0x10] sm:$0xff]  ;;  %v419_v9 = vld [vmem:[%s378_s16 + $0x18] sm:$0xff]  ;;  %v2254_v10 = vmax.f32 %v416_v5, %v417_v6  ;;  %v428_v11 = vld [vmem:[%s378_s16 + $0x60] sm:$0xff]  ;;  %s1776_s24 = sshll.u32 %s365_s22, 3  ;;  %s1781_s29 = sshll.u32 %s387_s25, 3 }
  0x15   : > { %v2257_v12 = vmax.f32 %v418_v8, %v419_v9  ;;  %v429_v13 = vld [vmem:[%s378_s16 + $0x68] sm:$0xff]  ;;  %v430_v14 = vld [vmem:[%s378_s16 + $0x70] sm:$0xff]  ;;  %v431_v15 = vld [vmem:[%s378_s16 + $0x78] sm:$0xff]  ;;  %s367_s28 = scalar_lea.vmem %s2624_s2, %s1776_s24  ;;  %s389_s12 = scalar_lea.vmem %s2626_s4, %s1781_s29 }
  0x16   : > { %v2137_v16 = vpack.i.bf16 %v2252_v7, %v2249_v4  ;;  %v441_v17 = vmax.f32 %v428_v11, %v429_v13  ;;  %v442_v18 = vmax.f32 %v430_v14, %v431_v15  ;;  %v420_v19 = vld [vmem:[%s378_s16 + $0x20] sm:$0xff]  ;;  %v421_v20 = vld [vmem:[%s378_s16 + $0x28] sm:$0xff]  ;;  %v422_v21 = vld [vmem:[%s378_s16 + $0x30] sm:$0xff]  ;;  %s1858_s29 = sshll.u32 %s2640_s9, 5  ;;  %s406_s15 = scalar_lea.vmem %s2629_s7, %s2640_s9 }
  0x17   : > { %v2127_v22 = vpack.i.bf16 %v2257_v12, %v2254_v10  ;;  %v423_v23 = vld [vmem:[%s378_s16 + $0x38] sm:$0xff]  ;;  %v437_v24 = vmax.f32 %v420_v19, %v421_v20  ;;  %v414_v30 = vld [vmem:[%s367_s28] sm:$0xff]  ;;  %v415_v31 = vld [vmem:[%s367_s28 + $0x8] sm:$0xff]  ;;  %s412_s18 = scalar_lea.vmem %s2630_s8, %s2640_s9 }
  0x18   : > { %2138 = vrot.lane.b32.xlu1 %v2137_v16, %s2171_s21  ;;  %v2142_v26 = vpack.i.bf16 %v442_v18, %v441_v17  ;;  %v438_v27 = vmax.f32 %v422_v21, %v423_v23  ;;  %v432_v32 = vld [vmem:[%s389_s12] sm:$0xff]  ;;  %v433_v33 = vld [vmem:[%s389_s12 + $0x8] sm:$0xff]  ;;  %v434_v34 = vmax.f32 %v414_v30, %v415_v31  ;;  %s2599_s12 = scalar_lea.vmem %s2628_s6, %s1858_s29 }
  0x19   : > { %2128 = vrot.lane.b32.xlu0 %v2127_v22, %s2171_s21  ;;  %v2288_v35 = vmax.f32 %v432_v32, %v433_v33 }
  0x1a   : > { %v2132_v29 = vpack.i.bf16 %v438_v27, %v437_v24 }
  0x1c   : > { %2143 = vrot.lane.b32.xlu1 %v2142_v26, %s2171_s21 }
  0x1d   : > { %2133 = vrot.lane.b32.xlu0 %v2132_v29, %s2171_s21 }
  0x20   : > { %472 = vrot.lane.b32.xlu1 %v2288_v35, %s2171_s21 }
  0x21   : > { %454 = vrot.lane.b32.xlu0 %v434_v34, %s2171_s21 }
  0x8a   : > { %v2139_v40 = vpop.permute.xlu1 %2138 }
  0x8b   : > { %v2129_v41 = vpop.permute.xlu0 %2128  ;;  %v2140_v42 = vunpack.i.l.bf16 %v2139_v40  ;;  %v2141_v46 = vunpack.i.h.bf16 %v2139_v40 }
  0x8c   : > { %v2131_v43 = vunpack.i.h.bf16 %v2129_v41  ;;  %v2130_v44 = vunpack.i.l.bf16 %v2129_v41 }
  0x8d   : > { %v2308_v51 = vmax.f32 %v2249_v4, %v2140_v42  ;;  %v2319_v57 = vmax.f32 %v2252_v7, %v2141_v46 }
  0x8e   : > { %v2144_v45 = vpop.permute.xlu1 %2143  ;;  %v486_v52 = vmax.f32 %v2257_v12, %v2131_v43  ;;  %v2312_v53 = vmax.f32 %v2254_v10, %v2130_v44  ;;  %v1150_v12 = vsel %vm647_vm0, %v1825_v39, 0 }
  0x8f   : > { %v2146_v47 = vunpack.i.h.bf16 %v2144_v45  ;;  %v2145_v48 = vunpack.i.l.bf16 %v2144_v45  ;;  %v2134_v49 = vpop.permute.xlu0 %2133  ;;  %v499_v61 = vpack.c.bf16 %v2308_v51, %v2308_v51  ;;  %v500_v0 = vpack.c.bf16 %v2319_v57, %v2319_v57 }
  0x90   : > { %v2136_v50 = vunpack.i.h.bf16 %v2134_v49  ;;  %v2135_v54 = vunpack.i.l.bf16 %v2134_v49  ;;  %v1863_v63 = vpack.c.bf16 %v486_v52, %v2312_v53  ;;  %v496_v3 = vpack.c.bf16 %v486_v52, %v486_v52 }
  0x91   : > { %v2314_v55 = vmax.f32 %v442_v18, %v2146_v47  ;;  %v2316_v56 = vmax.f32 %v441_v17, %v2145_v48  ;;  %v495_v4 = vpack.c.bf16 %v2312_v53, %v2312_v53  ;;  %v2337_v5 = vshrl.u32 %v499_v61, 16  ;;  %v1831_v17 = vld [vmem:[%s2627_s5 + $0x8] sm:$0xf] }
  0x92   : > { %v2323_v59 = vmax.f32 %v438_v27, %v2136_v50  ;;  %v487_v62 = vmax.f32 %v437_v24, %v2135_v54  ;;  %1978 = vmatprep.mubr.msk.bf16.mxu0 %vm683_vm1, %v1863_v63  ;;  %v2343_v9 = vshrl.u32 %v500_v0, 16  ;;  %v2349_v13 = vshll.u32 %v496_v3, 16 }
  0x93   : > { %v1866_v58 = vpack.c.bf16 %v2314_v55, %v2316_v56  ;;  %v455_v60 = vpop.permute.xlu0 %454  ;;  %v502_v7 = vpack.c.bf16 %v2314_v55, %v2314_v55  ;;  %v2351_v14 = vshll.u32 %v495_v4, 16  ;;  %v501_v15 = vpack.c.bf16 %v2316_v56, %v2316_v56 }
  0x94   : > { %v498_v1 = vpack.c.bf16 %v2323_v59, %v2323_v59  ;;  %v2333_v2 = vmax.f32 %v434_v34, %v455_v60  ;;  %v497_v6 = vpack.c.bf16 %v487_v62, %v487_v62  ;;  %v1864_v11 = vpack.c.bf16 %v2323_v59, %v487_v62 }
  0x95   : > { %v2355_v16 = vpack.c.bf16 %v487_v62, %v486_v52  ;;  %v564_v18 = vrot.slane %v2337_v5, 7  ;;  %v2362_v19 = vshrl.u32 %v495_v4, 16  ;;  %v2364_v20 = vshrl.u32 %v496_v3, 16 }
  0x96   : > { %v2341_v8 = vshrl.u32 %v498_v1, 16  ;;  %v494_v10 = vpack.c.bf16 %v2333_v2, %v2333_v2  ;;  %1979 = vmatmul.mubr.msk.bf16.vlgmr.msra.gmra.mrb[0].mxu0 %vm683_vm1, %v1864_v11  ;;  %v2366_v21 = vshrl.u32 %v497_v6, 16  ;;  %v2368_v22 = vshrl.u32 %v502_v7, 16 }
  0x97   : > { %v2370_v23 = vshll.u32 %v498_v1, 16  ;;  %v2372_v24 = vshll.u32 %v497_v6, 16  ;;  %1988 = vmatprep.mubr.msk.bf16.mxu0 %vm683_vm1, %v2355_v16  ;;  %1987 = vmatpush3.bf16.msra.mxu0 %v1150_v12  ;;  %v548_v29 = vrot.slane %v2362_v19, 7  ;;  %v552_v30 = vrot.slane %v2364_v20, 7  ;;  %v1801_v6 = vld [vmem:[%s2627_s5 + $0x18] sm:$0xf] }
  0x98   : > { %v560_v26 = vrot.slane %v2341_v8, 7  ;;  %v2377_v27 = vshrl.u32 %v494_v10, 16  ;;  %v556_v31 = vrot.slane %v2366_v21, 7  ;;  %2099 = vmatprep.subr.msk.bf16.mxu0 %vm647_vm0, %v1831_v17  ;;  %v568_v32 = vrot.slane %v2343_v9, 7 }
  0x99   : > { %v2384_v33 = vshll.u32 %v499_v61, 16  ;;  %v2386_v34 = vshrl.u32 %v501_v15, 16  ;;  %v2395_v39 = vshll.u32 %v494_v10, 16  ;;  %v551_v40 = vor.u32 %v2351_v14, %v548_v29  ;;  %v1840_v29 = vld [vmem:[%s2627_s5 + $0x14] sm:$0xf] }
  0x9a   : > { %v563_v36 = vor.u32 %v2370_v23, %v560_v26  ;;  %v555_v41 = vor.u32 %v2349_v13, %v552_v30  ;;  %v559_v42 = vor.u32 %v2372_v24, %v556_v31  ;;  %v2400_v43 = vshll.u32 %v500_v0, 16  ;;  %v473_v30 = vpop.permute.xlu1 %472 }
  0x9b   : > { %v576_v44 = vrot.slane %v2368_v22, 7  ;;  %v567_v46 = vor.u32 %v2384_v33, %v564_v18  ;;  %v544_v47 = vrot.slane %v2377_v27, 7  ;;  %v598_v48 = vsel %vm2391_vm4, %v2362_v19, %v551_v40 }
  0x9c   : > { %v2406_v45 = vsel %vm2391_vm4, %v2341_v8, %v563_v36  ;;  %v2416_v49 = vsel %vm2391_vm4, %v2364_v20, %v555_v41  ;;  %v600_v50 = vsel %vm2391_vm4, %v2366_v21, %v559_v42  ;;  %v2421_v52 = vshll.u32 %v502_v7, 16 }
  0x9d   : > { %v572_v54 = vrot.slane %v2386_v34, 7  ;;  %v1785_v60 = vcombine.low %v598_v48, %v2416_v49  ;;  %v1786_v61 = vcombine.low %v600_v50, %v2406_v45  ;;  %v607_v62 = vrot.slane %v2395_v39, 1 }
  0x9e   : > { %v784_v63 = vsel %vm647_vm0, %v2299_v38, 0  ;;  %v571_v0 = vor.u32 %v2400_v43, %v568_v32  ;;  %v602_v1 = vsel %vm2391_vm4, %v2337_v5, %v567_v46  ;;  %v2433_v3 = vshll.u32 %v501_v15, 16 }
  0x9f   : > { %1938 = vmatprep.mubr.msk.bf16.mxu1 %vm683_vm1, %v1785_v60  ;;  %v579_v4 = vor.u32 %v2421_v52, %v576_v44  ;;  %v2442_v7 = vpack.c.bf16 %v2308_v51, %v2323_v59  ;;  %v547_v38 = vor.u32 %v2395_v39, %v544_v47  ;;  %v609_v10 = vrot.slane %v2351_v14, 1 }
  0xa0   : > { %1939 = vmatmul.mubr.msk.bf16.vlgmr.msra.gmra.mrb[0].mxu1 %vm683_vm1, %v1786_v61  ;;  %v2450_v11 = vsel %vm2391_vm4, %v2343_v9, %v571_v0  ;;  %v2455_v15 = vpack.c.bf16 %v2316_v56, %v2319_v57  ;;  %v575_v59 = vor.u32 %v2433_v3, %v572_v54  ;;  %v1260_v18 = vsel %vm647_vm0, %v1831_v17, 0 }
  0xa1   : > { %1947 = vmatpush3.bf16.msra.mxu1 %v784_v63  ;;  %v1787_v12 = vcombine.low %v602_v1, %v2450_v11  ;;  %v608_v26 = vor.u32 %v607_v62, %v2377_v27  ;;  %v2472_v17 = vsel %vm2391_vm4, %v2368_v22, %v579_v4  ;;  %v597_v31 = vsel %vm2391_vm4, %v2377_v27, %v547_v38 }
  0xa2   : > { %1989 = vmatmul.mubr.msk.bf16.vlgmr.msra.gmra.mrb[0].mxu0 %vm683_vm1, %v2442_v7  ;;  %2094 = vmatprep.subr.msk.bf16.mxu1 %vm647_vm0, %v1801_v6  ;;  %v610_v32 = vor.u32 %v609_v10, %v2362_v19  ;;  %v617_v36 = vrot.slane %v2384_v33, 1  ;;  %v613_v40 = vrot.slane %v2372_v24, 1  ;;  %v604_v42 = vsel %vm2391_vm4, %v2386_v34, %v575_v59 }
  0xa3   : > { %1942 = vmatprep.mubr.msk.bf16.mxu1 %vm683_vm1, %v1787_v12  ;;  %1992 = vmatprep.mubr.msk.bf16.mxu0 %vm683_vm1, %v2455_v15  ;;  %v615_v27 = vrot.slane %v2370_v23, 1  ;;  %v493_v19 = vmax.f32 %v2288_v35, %v473_v30  ;;  %v1788_v44 = vcombine.low %v604_v42, %v2472_v17  ;;  %v650_v46 = vsel %vm2481_vm6, %v608_v26, %v2395_v39 }
  0xa4   : > { %1997 = vmatpush3.bf16.msra.mxu0 %v1260_v18  ;;  %v611_v47 = vrot.slane %v2349_v13, 1  ;;  %v1793_v54 = vcombine.low %v597_v31, %v598_v48  ;;  %v1865_v60 = vpack.c.bf16 %v2319_v57, %v2308_v51  ;;  %v651_v35 = vsel %vm2481_vm6, %v610_v32, %v2351_v14 }
  0xa5   : > { %2100 = vmatprep.subr.msk.bf16.mxu0 %vm647_vm0, %v1840_v29  ;;  %v1867_v61 = vpack.c.bf16 %v493_v19, %v2314_v55  ;;  %v614_v62 = vor.u32 %v613_v40, %v2366_v21  ;;  %v1832_v63 = vcombine.low %v650_v46, %v651_v35  ;;  %v616_v39 = vor.u32 %v615_v27, %v2341_v8 }
  0xa6   : > { %v618_v48 = vor.u32 %v617_v36, %v2337_v5  ;;  %v612_v0 = vor.u32 %v611_v47, %v2364_v20  ;;  %v619_v4 = vrot.slane %v2400_v43, 1  ;;  %v621_v38 = vrot.slane %v2433_v3, 1 }
  0xa7   : > { %v653_v14 = vsel %vm2481_vm6, %v614_v62, %v2372_v24  ;;  %v1794_v21 = vcombine.low %v2416_v49, %v600_v50  ;;  %v860_v10 = vsel %vm647_vm0, %v1801_v6, 0  ;;  %v654_v5 = vsel %vm2481_vm6, %v616_v39, %v2370_v23  ;;  %v1807_v24 = vld [vmem:[%s2627_s5 + $0x4] sm:$0xf] }
  0xa8   : > { %1943 = vmatmul.mubr.msk.bf16.gmra.mrb[4].mxu1 %vm683_vm1, %v1788_v44  ;;  %v655_v8 = vsel %vm2481_vm6, %v618_v48, %v2384_v33  ;;  %v652_v20 = vsel %vm2481_vm6, %v612_v0, %v2349_v13  ;;  %v1795_v12 = vcombine.low %v2406_v45, %v602_v1  ;;  %v1356_v50 = vsel %vm647_vm0, %v1840_v29, 0  ;;  %v1849_v13 = vld [vmem:[%s2627_s5 + $0x20] sm:$0xf] }
  0xa9   : > { %1948 = vmatprep.mubr.msk.bf16.mxu1 %vm683_vm1, %v1793_v54  ;;  %v1833_v49 = vcombine.low %v652_v20, %v653_v14  ;;  %v1834_v23 = vcombine.low %v654_v5, %v655_v8  ;;  %v620_v33 = vor.u32 %v619_v4, %v2343_v9  ;;  %v622_v6 = vor.u32 %v621_v38, %v2386_v34 }
  0xaa   : > { %1993 = vmatmul.mubr.msk.bf16.gmra.mrb[4].mxu0 %vm683_vm1, %v1867_v61  ;;  %v503_v45 = vpack.c.bf16 %v493_v19, %v493_v19  ;;  %v1796_v1 = vcombine.low %v2450_v11, %v604_v42  ;;  %v1841_v26 = vcombine.low %v651_v35, %v652_v20  ;;  %v970_v31 = vsel %vm647_vm0, %v1807_v24, 0 }
  0xab   : > { %1998 = vmatprep.mubr.msk.bf16.mxu0 %vm683_vm1, %v1832_v63  ;;  %v656_v9 = vsel %vm2481_vm6, %v620_v33, %v2400_v43  ;;  %v657_v34 = vsel %vm2481_vm6, %v622_v6, %v2433_v3  ;;  %v623_v43 = vrot.slane %v2421_v52, 1  ;;  %v1842_v32 = vcombine.low %v653_v14, %v654_v5 }
  0xac   : > { %v532_v59 = vshrl.u32 %v503_v45, 16  ;;  %v1835_v18 = vcombine.low %v656_v9, %v657_v34  ;;  %v581_v30 = vshll.u32 %v503_v45, 16  ;;  %v1440_v11 = vsel %vm647_vm0, %v1849_v13, 0 }
  0xad   : > { %v1843_v36 = vcombine.low %v655_v8, %v656_v9  ;;  %v624_v40 = vor.u32 %v623_v43, %v2368_v22  ;;  %v1859_v22 = vpack.c.bf16 %v2312_v53, %v2333_v2 }
  0xae   : > { %v580_v29 = vrot.slane %v532_v59, 7 }
  0xaf   : > { %v658_v27 = vsel %vm2481_vm6, %v624_v40, %v2421_v52 }
  0xb0   : > { %1949 = vmatmul.mubr.msk.bf16.vlgmr.msra.gmra.mrb[0].mxu1 %vm683_vm1, %v1794_v21  ;;  %v583_v3 = vor.u32 %v581_v30, %v580_v29  ;;  %v1844_v44 = vcombine.low %v657_v34, %v658_v27 }
  0xb1   : > { %1957 = vmatpush3.bf16.msra.mxu1 %v860_v10  ;;  %1952 = vmatprep.mubr.msk.bf16.mxu1 %vm683_vm1, %v1795_v12 }
  0xb2   : > { %1999 = vmatmul.mubr.msk.bf16.vlgmr.msra.gmra.mrb[0].mxu0 %vm683_vm1, %v1833_v49  ;;  %2095 = vmatprep.subr.msk.bf16.mxu1 %vm647_vm0, %v1807_v24  ;;  %v606_v42 = vsel %vm2391_vm4, %v532_v59, %v583_v3 }
  0xb3   : > { %2002 = vmatprep.mubr.msk.bf16.mxu0 %vm683_vm1, %v1834_v23  ;;  %2007 = vmatpush3.bf16.msra.mxu0 %v1356_v50  ;;  %v1802_v19 = vcombine.low %v2472_v17, %v606_v42 }
  0xb4   : > { %2101 = vmatprep.subr.msk.bf16.mxu0 %vm647_vm0, %v1849_v13 }
  0xb8   : > { %1953 = vmatmul.mubr.msk.bf16.gmra.mrb[4].mxu1 %vm683_vm1, %v1796_v1 }
  0xb9   : > { %1958 = vmatprep.mubr.msk.bf16.mxu1 %vm683_vm1, %v1794_v21 }
  0xba   : > { %2003 = vmatmul.mubr.msk.bf16.gmra.mrb[4].mxu0 %vm683_vm1, %v1835_v18 }
  0xbb   : > { %2008 = vmatprep.mubr.msk.bf16.mxu0 %vm683_vm1, %v1841_v26 }
  0xc0   : > { %1959 = vmatmul.mubr.msk.bf16.vlgmr.msra.gmra.mrb[0].mxu1 %vm683_vm1, %v1795_v12 }
  0xc1   : > { %1967 = vmatpush3.bf16.msra.mxu1 %v970_v31  ;;  %1962 = vmatprep.mubr.msk.bf16.mxu1 %vm683_vm1, %v1796_v1 }
  0xc2   : > { %2009 = vmatmul.mubr.msk.bf16.vlgmr.msra.gmra.mrb[0].mxu0 %vm683_vm1, %v1842_v32  ;;  %2097 = vmatprep.subr.msk.bf16.mxu1 %vm647_vm0, %v2269_v25  ;;  %v625_v25 = vrot.slane %v581_v30, 1 }
  0xc3   : > { %2012 = vmatprep.mubr.msk.bf16.mxu0 %vm683_vm1, %v1843_v36  ;;  %2017 = vmatpush3.bf16.msra.mxu0 %v1440_v11 }
  0xc4   : > { %v626_v37 = vor.u32 %v625_v25, %v532_v59 }
  0xc6   : > { %v659_v53 = vsel %vm2481_vm6, %v626_v37, %v581_v30 }
  0xc7   : > { %v1850_v2 = vcombine.low %v658_v27, %v659_v53 }
  0xc8   : > { %1963 = vmatmul.mubr.msk.bf16.gmra.mrb[4].mxu1 %vm683_vm1, %v1802_v19 }
  0xc9   : > { %1968 = vmatprep.mubr.msk.bf16.mxu1 %vm683_vm1, %v1859_v22 }
  0xca   : > { %2013 = vmatmul.mubr.msk.bf16.gmra.mrb[4].mxu0 %vm683_vm1, %v1844_v44 }
  0xcb   : > { %2018 = vmatprep.mubr.msk.bf16.mxu0 %vm683_vm1, %v1833_v49 }
  0xd0   : > { %1969 = vmatmul.mubr.msk.bf16.vlgmr.msra.gmra.mrb[0].mxu1 %vm683_vm1, %v2355_v16 }
  0xd1   : > { %2027 = vmatpush3.bf16.msra.mxu1 %v2277_v28  ;;  %1972 = vmatprep.mubr.msk.bf16.mxu1 %vm683_vm1, %v2442_v7 }
  0xd2   : > { %2019 = vmatmul.mubr.msk.bf16.vlgmr.msra.gmra.mrb[0].mxu0 %vm683_vm1, %v1834_v23 }
  0xd3   : > { %2022 = vmatprep.mubr.msk.bf16.mxu0 %vm683_vm1, %v1835_v18 }
  0xd8   : > { %1973 = vmatmul.mubr.msk.bf16.gmra.mrb[4].mxu1 %vm683_vm1, %v2455_v15 }
  0xd9   : > { %1982 = vmatprep.mubr.msk.bf16.mxu1 %vm683_vm1, %v1865_v60 }
  0xda   : > { %2023 = vmatmul.mubr.msk.bf16.gmra.mrb[4].mxu0 %vm683_vm1, %v1850_v2 }
  0xe4   : > { %1983 = vmatmul.mubr.msk.bf16.vlgmr.msra.gmra.mrb[4].mxu1 %vm683_vm1, %v1866_v58 }
 0x1a3   : > { %v1970_v28 = vpop.f32.mrb[0].mxu1 }
 0x1a4   : > { %v1006_v16 = vpop.f32.mrb[1].mxu1 }
 0x1a5   : > { %v1971_v52 = vpop.f32.mrb[2].mxu1  ;;  %v2020_v7 = vpop.f32.mrb[0].mxu0 }
 0x1a6   : > { %v1009_v17 = vpop.f32.mrb[3].mxu1  ;;  %v2028_v41 = vadd.f32 %v2020_v7, %v1970_v28  ;;  %v1476_v15 = vpop.f32.mrb[1].mxu0 }
 0x1a7   : > { %v2029_v46 = vadd.f32 %v1476_v15, %v1006_v16  ;;  %v2021_v47 = vpop.f32.mrb[2].mxu0 }
 0x1a8   : > { %v2030_v51 = vadd.f32 %v2021_v47, %v1971_v52  ;;  %v1479_v57 = vpop.f32.mrb[3].mxu0  ;;  %v1547_v35 = vmul.f32 %v2028_v41, %v2028_v41 }
 0x1a9   : > { %v2031_v55 = vadd.f32 %v1479_v57, %v1009_v17  ;;  %v1545_v58 = vmul.f32 %v2029_v46, %v2029_v46 }
 0x1aa   : > { %v1876_v56 = vpack.c.bf16 %v2030_v51, %v2028_v41  ;;  %v1548_v0 = vmul.f32 %v2030_v51, %v2030_v51 }
 0x1ab   : > { %v1871_v54 = vpack.c.bf16 %v2031_v55, %v2029_v46  ;;  %v1531_v60 = vadd.f32 %v2031_v55, %v2029_v46  ;;  %v1546_v61 = vmul.f32 %v2031_v55, %v2031_v55 }
 0x1ac   : > { %1888 = vst [vmem:[%s2599_s12 + $0x8] sm:$0xff] %v1876_v56  }
 0x1ad   : > { %1872 = vst [vmem:[%s2599_s12] sm:$0xff] %v1871_v54   ;;  %v1532_v62 = vadd.f32 %v2028_v41, %v1531_v60  ;;  %v1553_v63 = vadd.f32 %v1546_v61, %v1545_v58  ;;  %v2024_v39 = vpop.f32.mrb[4].mxu0 }
 0x1ae   : > { %v1492_v48 = vpop.f32.mrb[5].mxu0 }
 0x1af   : > { %v1554_v4 = vadd.f32 %v1553_v63, %v1547_v35  ;;  %v2025_v38 = vpop.f32.mrb[6].mxu0  ;;  %v1533_v14 = vadd.f32 %v2030_v51, %v1532_v62 }
 0x1b0   : > { %v1495_v21 = vpop.f32.mrb[7].mxu0 }
 0x1b1   : > { %v1555_v10 = vadd.f32 %v1554_v4, %v1548_v0 }
 0x1b7   : > { %v1984_v5 = vpop.f32.mrb[4].mxu1 }
 0x1b8   : > { %v2032_v8 = vadd.f32 %v2024_v39, %v1984_v5  ;;  %v1118_v20 = vpop.f32.mrb[5].mxu1 }
 0x1b9   : > { %v2033_v12 = vadd.f32 %v1492_v48, %v1118_v20  ;;  %v1985_v24 = vpop.f32.mrb[6].mxu1 }
 0x1ba   : > { %v2034_v49 = vadd.f32 %v2025_v38, %v1985_v24  ;;  %v1121_v50 = vpop.f32.mrb[7].mxu1  ;;  %v1551_v59 = vmul.f32 %v2032_v8, %v2032_v8 }
 0x1bb   : > { %v1534_v23 = vadd.f32 %v2033_v12, %v1533_v14  ;;  %v1549_v33 = vmul.f32 %v2033_v12, %v2033_v12  ;;  %v2035_v6 = vadd.f32 %v1495_v21, %v1121_v50 }
 0x1bc   : > { %v1886_v13 = vpack.c.bf16 %v2034_v49, %v2032_v8  ;;  %v1552_v29 = vmul.f32 %v2034_v49, %v2034_v49 }
 0x1bd   : > { %v1556_v45 = vadd.f32 %v1555_v10, %v1549_v33  ;;  %v1881_v9 = vpack.c.bf16 %v2035_v6, %v2033_v12  ;;  %v1535_v34 = vadd.f32 %v2035_v6, %v1534_v23  ;;  %v1550_v1 = vmul.f32 %v2035_v6, %v2035_v6 }
 0x1be   : > { %1890 = vst [vmem:[%s2599_s12 + $0x18] sm:$0xff] %v1886_v13  }
 0x1bf   : > { %1889 = vst [vmem:[%s2599_s12 + $0x10] sm:$0xff] %v1881_v9   ;;  %v1536_v18 = vadd.f32 %v2032_v8, %v1535_v34  ;;  %v1557_v26 = vadd.f32 %v1556_v45, %v1550_v1 }
 0x1c1   : > { %v1537_v43 = vadd.f32 %v2034_v49, %v1536_v18  ;;  %v1558_v30 = vadd.f32 %v1557_v26, %v1551_v59 }
 0x1c3   : > { %v1538_v31 = vrot.slane %v1537_v43, 4  ;;  %v1559_v3 = vadd.f32 %v1558_v30, %v1552_v29 }
 0x1c5   : > { %v1539_v32 = vadd.f32 %v1538_v31, %v1537_v43  ;;  %v1560_v11 = vrot.slane %v1559_v3, 4 }
 0x1c7   : > { %v1540_v36 = vrot.slane %v1539_v32, 2  ;;  %v1561_v40 = vadd.f32 %v1560_v11, %v1559_v3 }
 0x1c9   : > { %v1541_v42 = vadd.f32 %v1540_v36, %v1539_v32  ;;  %v1562_v27 = vrot.slane %v1561_v40, 2 }
 0x1cb   : > { %v1542_v19 = vrot.slane %v1541_v42, 1  ;;  %v1563_v22 = vadd.f32 %v1562_v27, %v1561_v40 }
 0x1cd   : > { %v1543_v44 = vadd.f32 %v1542_v19, %v1541_v42  ;;  %v1564_v25 = vrot.slane %v1563_v22, 1 }
 0x1cf   : > { %1544 = vst [vmem:[%s406_s15] sm:$0x1] %v1543_v44  ;;  %v1565_v37 = vadd.f32 %v1564_v25, %v1563_v22 }
 0x1d1   : > { %1566 = vst [vmem:[%s412_s18] sm:$0x1] %v1565_v37 }
 0x1d2 PF: > { %s21_s11 = sadd.s32 1, %s2169_s11   ;;  %s2635_s9 = smov %s2165_s10 }
 0x1d3   : > { %p18_p7 = scmp.ge.s32.totalorder %s21_s11, 4   ;;  %s2636_s10 = smov %s2638_s0 }
 0x1d5   :  { %20 = sbr.rel (!%p18_p7) target bundleno = 3 (0x3), region = 104 }

// kernel: down_forward.4
= control target key start
LH: loop header
LB: loop body
LE: loop exit
PB: predicated region body
PF: predicated region fallthrough
CT: control target
= control target key end

     0   :  { %s3155_s17 = smov 0   ;;  %s3157_s18 = smov 0   ;;  %s3776_s0 = inlined_call_operand.<no memory space> [shape: s32[1], index: 0, kind: input, shape index: {}]   ;;  %s3777_s1 = inlined_call_operand.<no memory space> [shape: s32[1], index: 1, kind: input, shape index: {}]   ;;  %s3778_s2 = inlined_call_operand.vmem [shape: bf16[2,8,8,128], index: 2, kind: input, shape index: {}, may-alias: {2,3,4}]   ;;  %s3779_s3 = inlined_call_operand.vmem [shape: bf16[2,8,8,128], index: 3, kind: input, shape index: {}, may-alias: {2,3,4}]   ;;  %s3780_s4 = inlined_call_operand.vmem [shape: bf16[2,8,8,128], index: 4, kind: input, shape index: {}, may-alias: {2,3,4}]   ;;  %s3781_s5 = inlined_call_operand.vmem [shape: bf16[9,128,128], index: 5, kind: input, shape index: {}]   ;;  %s3782_s6 = inlined_call_operand.vmem [shape: f32[1,128], index: 6, kind: input, shape index: {}]   ;;  %s3783_s7 = inlined_call_operand.vmem [shape: f32[1,128], index: 7, kind: input, shape index: {}]   ;;  %s3784_s8 = inlined_call_operand.vmem [shape: bf16[2,8,8,128], index: 8, kind: output, shape index: {0}]   ;;  %s3785_s9 = inlined_call_operand.vmem [shape: f32[2,1,1,128], index: 9, kind: output, shape index: {1}]   ;;  %s3786_s10 = inlined_call_operand.vmem [shape: f32[2,1,1,128], index: 10, kind: output, shape index: {2}]  }
   0x1   :  { %16 = sst [smem:[#allocation3]] %s3776_s0  ;;  %s3159_s19 = smov 0  }
   0x2   :  { %17 = sst [smem:[#allocation4]] %s3777_s1 }
   0x3 LB: > { %s35_s0 = sadd.s32 1, %s3088_s18  ;;  %p2277_p0 = scmp.ge.s32.totalorder %s3092_s19, 1  ;;  %s3092_s19 = sphi %s3159_s19, %s23_s19   ;;  %s3088_s18 = sphi %s3157_s18, %s3792_s18   ;;  %s3084_s17 = sphi %s3155_s17, %s3791_s17  }
   0x4   : > { %p37_p1 = scmp.ge.s32.totalorder %s35_s0, 2  ;;  %p334_p2 = scmp.lt.s32.totalorder %s3092_s19, 3 }
   0x6   : > { %s3794_s0 = smov (%p37_p1, %s35_s0), 0  ;;  %p335_p3 = pnand %p2277_p0, %p334_p2 }
   0x7   : > { %v2998_v0 = vld [vmem:[%s3781_s5 + $0xc0] sm:$0xff] (!%p335_p3)   ;;  %v3000_v2 = vld [vmem:[%s3781_s5 + $0xc8] sm:$0xff] (!%p335_p3)   ;;  %p407_p4 = scmp.lt.s32.totalorder (!%p335_p3), %s3084_s17, 1  ;;  %v3002_v4 = vld [vmem:[%s3781_s5 + $0xd0] sm:$0xff] (!%p335_p3)   ;;  %s3216_s27 = sld [smem:[#allocation3]] (!%p335_p3)  ;;  %vm623_vm0 = vcmask (!%p335_p3), 1040384  }
   0x8   : > { %338 = sbr.rel (%p335_p3) target bundleno = 415 (0x19f), region = 44  ;;  %v2999_v1 = vld [vmem:[%s3781_s5 + $0x100] sm:$0xff] (!%p335_p3)   ;;  %2678 = vmatprep.subr.bf16.mxu1 (!%p335_p3), %v2998_v0  ;;  %v3001_v3 = vld [vmem:[%s3781_s5 + $0x108] sm:$0xff] (!%p335_p3)   ;;  %v3003_v5 = vld [vmem:[%s3781_s5 + $0x110] sm:$0xff] (!%p335_p3)   ;;  %vm624_vm1 = vsmask.f32 (!%p335_p3), 256 }
   0x9   : > { %2774 = vmatprep.subr.bf16.mxu0 (!%p335_p3), %v2999_v1  ;;  %2679 = vmatpush3.bf16.msra.mxu1 (!%p335_p3), %v2998_v0  ;;  %v3004_v6 = vld [vmem:[%s3781_s5 + $0xd8] sm:$0xff] (!%p335_p3)   ;;  %v3006_v8 = vld [vmem:[%s3781_s5 + $0xe0] sm:$0xff] (!%p335_p3)   ;;  %v3008_v10 = vld [vmem:[%s3781_s5 + $0xe8] sm:$0xff] (!%p335_p3)   ;;  %s3276_s29 = sld [smem:[#allocation4]] (!%p335_p3)  ;;  %vm676_vm3 = vcmask (!%p335_p3), 1043456  }
   0xa   : > { %2775 = vmatpush3.bf16.msra.mxu0 (!%p335_p3), %v2999_v1  ;;  %2680 = vmatprep.subr.bf16.mxu1 (!%p335_p3), %v3000_v2  ;;  %v3005_v7 = vld [vmem:[%s3781_s5 + $0x118] sm:$0xff] (!%p335_p3)   ;;  %v3007_v9 = vld [vmem:[%s3781_s5 + $0x120] sm:$0xff] (!%p335_p3)   ;;  %v3009_v14 = vld [vmem:[%s3781_s5 + $0x128] sm:$0xff] (!%p335_p3)   ;;  %vm677_vm4 = vsmask.f32 (!%p335_p3), 3328 }
   0xb   : > { %2776 = vmatprep.subr.bf16.mxu0 (!%p335_p3), %v3001_v3  ;;  %v3223_v13 = vld [vmem:[%s3782_s6] ss:$0 sm:$0xff] (!%p335_p3)  ;;  %v3010_v20 = vld [vmem:[%s3781_s5 + $0xf0] sm:$0xff] (!%p335_p3)   ;;  %v3012_v30 = vld [vmem:[%s3781_s5 + $0xf8] sm:$0xff] (!%p335_p3)  }
   0xc   : > { %v3231_v18 = vld [vmem:[%s3783_s7] ss:$0 sm:$0xff] (!%p335_p3)  ;;  %v3011_v24 = vld [vmem:[%s3781_s5 + $0x130] sm:$0xff] (!%p335_p3)   ;;  %v3013_v35 = vld [vmem:[%s3781_s5 + $0x138] sm:$0xff] (!%p335_p3)  }
   0xd   : > { %2681 = vmatpush3.bf16.msra.mxu1 (!%p335_p3), %v3000_v2  ;;  %p409_p5 = scmp.lt.s32.totalorder (!%p335_p3), %s3216_s27, 7  ;;  %v3014_v45 = vld [vmem:[%s3781_s5] sm:$0xff] (!%p335_p3)   ;;  %vm3308_vm2 = vmand (!%p335_p3), %vm623_vm0, %vm624_vm1  ;;  %v3017_v63 = vld [vmem:[%s3781_s5 + $0x1c8] sm:$0xff] (!%p335_p3)  }
   0xe   : > { %2777 = vmatpush3.bf16.msra.mxu0 (!%p335_p3), %v3001_v3  ;;  %2682 = vmatprep.subr.bf16.mxu1 (!%p335_p3), %v3002_v4  ;;  %v3015_v48 = vld [vmem:[%s3781_s5 + $0x1c0] sm:$0xff] (!%p335_p3)   ;;  %vm3498_vm5 = vmand (!%p335_p3), %vm676_vm3, %vm677_vm4 }
   0xf   : > { %s3796_s17 = smov (!%p407_p4, %s3084_s17), 1  ;;  %2778 = vmatprep.subr.bf16.mxu0 %v3003_v5  ;;  %s3798_s27 = smov (!%p409_p5, %s3216_s27), 7 }
  0x10   : > { %s2517_s15 = sshll.u32 %s3796_s17, 5  ;;  %s2278_s21 = sshll.u32 %s3796_s17, 3 }
  0x11   : > { %2683 = vmatpush3.bf16.msra.mxu1 %v3002_v4  ;;  %s3211_s24 = scalar_lea.vmem %s3779_s3, %s2517_s15  ;;  %s412_s28 = sadd.s32 %s2278_s21, %s3798_s27 }
  0x12   : > { %2779 = vmatpush3.bf16.msra.mxu0 %v3003_v5  ;;  %2684 = vmatprep.subr.bf16.mxu1 %v3004_v6  ;;  %v2529_v11 = vld [vmem:[%s3211_s24] sm:$0xff]   ;;  %v2564_v12 = vld [vmem:[%s3211_s24 + $0x8] sm:$0xff]   ;;  %s2279_s30 = sshll.u32 %s412_s28, 2  ;;  %v2565_v4 = vld [vmem:[%s3211_s24 + $0x10] sm:$0xff]   ;;  %p429_p6 = scmp.lt.s32.totalorder %s3276_s29, 7 }
  0x13   : > { %2780 = vmatprep.subr.bf16.mxu0 %v3005_v7  ;;  %v2530_v15 = vunpack.c.l.bf16 %v2529_v11  ;;  %v2531_v16 = vunpack.c.h.bf16 %v2529_v11  ;;  %v2534_v17 = vunpack.c.l.bf16 %v2564_v12  ;;  %v2535_v19 = vunpack.c.h.bf16 %v2564_v12  ;;  %s414_s14 = scalar_lea.vmem %s3778_s2, %s2279_s30  ;;  %v2566_v11 = vld [vmem:[%s3211_s24 + $0x18] sm:$0xff]   ;;  %s444_s16 = scalar_lea.vmem %s3784_s8, %s2517_s15 }
  0x14   : > { %v459_v50 = vld [vmem:[%s414_s14] sm:$0xf]  ;;  %s3800_s29 = smov (!%p429_p6, %s3276_s29), 7  ;;  %s451_s20 = scalar_lea.vmem %s3785_s9, %s3796_s17 }
  0x15   : > { %2685 = vmatpush3.bf16.msra.mxu1 %v3004_v6  ;;  %v487_v21 = vmul.f32 %v2530_v15, %v3223_v13  ;;  %v488_v22 = vmul.f32 %v2531_v16, %v3223_v13  ;;  %v489_v23 = vmul.f32 %v2534_v17, %v3223_v13  ;;  %v490_v25 = vmul.f32 %v2535_v19, %v3223_v13  ;;  %v3019_v17 = vld [vmem:[%s3781_s5 + $0x1d0] sm:$0xff]   ;;  %s3415_s1 = sadd.s32 %s2278_s21, %s3800_s29  ;;  %s457_s29 = scalar_lea.vmem %s3786_s10, %s3796_s17 }
  0x16   : > { %2781 = vmatpush3.bf16.msra.mxu0 %v3005_v7  ;;  %2686 = vmatprep.subr.bf16.mxu1 %v3006_v8  ;;  %v469_v55 = vunpack.c.l.bf16 %v459_v50  ;;  %v2538_v7 = vunpack.c.l.bf16 %v2565_v4  ;;  %v2542_v16 = vunpack.c.l.bf16 %v2566_v11  ;;  %s2283_s21 = sshll.u32 %s3415_s1, 2 }
  0x17   : > { %2782 = vmatprep.subr.bf16.mxu0 %v3007_v9  ;;  %v504_v26 = vadd.f32 %v3231_v18, %v487_v21  ;;  %v505_v27 = vadd.f32 %v3231_v18, %v488_v22  ;;  %v506_v28 = vadd.f32 %v3231_v18, %v489_v23  ;;  %v507_v29 = vadd.f32 %v3231_v18, %v490_v25  ;;  %s434_s28 = scalar_lea.vmem %s3780_s4, %s2283_s21 }
  0x18   : > { %v486_v62 = vmul.f32 %v3223_v13, %v469_v55  ;;  %v491_v15 = vmul.f32 %v2538_v7, %v3223_v13  ;;  %v493_v23 = vmul.f32 %v2542_v16, %v3223_v13 }
  0x19   : > { %2687 = vmatpush3.bf16.msra.mxu1 %v3006_v8  ;;  %v3252_v31 = vmax.f32 %v504_v26, 0.0  ;;  %v3254_v32 = vmax.f32 %v505_v27, 0.0  ;;  %v3256_v33 = vmax.f32 %v506_v28, 0.0  ;;  %v3259_v34 = vmax.f32 %v507_v29, 0.0  ;;  %v3018_v27 = vld [vmem:[%s3781_s5 + $0x10] sm:$0xff]  }
  0x1a   : > { %2783 = vmatpush3.bf16.msra.mxu0 %v3007_v9  ;;  %2688 = vmatprep.subr.bf16.mxu1 %v3008_v10  ;;  %v503_v5 = vadd.f32 %v3231_v18, %v486_v62  ;;  %v3016_v9 = vld [vmem:[%s3781_s5 + $0x8] sm:$0xff]   ;;  %v508_v22 = vadd.f32 %v3231_v18, %v491_v15  ;;  %v510_v29 = vadd.f32 %v3231_v18, %v493_v23 }
  0x1b   : > { %2784 = vmatprep.subr.bf16.mxu0 %v3009_v14  ;;  %v524_v36 = vpack.c.bf16 %v3252_v31, %v3252_v31  ;;  %v525_v37 = vpack.c.bf16 %v3254_v32, %v3254_v32  ;;  %v526_v38 = vpack.c.bf16 %v3256_v33, %v3256_v33  ;;  %v2523_v39 = vpack.c.bf16 %v3254_v32, %v3252_v31  ;;  %v3025_v15 = vld [vmem:[%s3781_s5 + $0x1e8] sm:$0xff]  }
  0x1c   : > { %v527_v40 = vpack.c.bf16 %v3259_v34, %v3259_v34  ;;  %v2524_v61 = vpack.c.bf16 %v3259_v34, %v3256_v33  ;;  %v3351_v12 = vmax.f32 %v503_v5, 0.0  ;;  %v3372_v28 = vmax.f32 %v508_v22, 0.0 }
  0x1d   : > { %2689 = vmatpush3.bf16.msra.mxu1 %v3008_v10  ;;  %v3278_v41 = vshrl.u32 %v524_v36, 16  ;;  %v3280_v42 = vshrl.u32 %v525_v37, 16  ;;  %v3282_v43 = vshrl.u32 %v526_v38, 16  ;;  %v3284_v44 = vshll.u32 %v524_v36, 16  ;;  %2790 = vmatprep.mubr.bf16.mxu0 %v2523_v39 }
  0x1e   : > { %2785 = vmatpush3.bf16.msra.mxu0 %v3009_v14  ;;  %2690 = vmatprep.subr.bf16.mxu1 %v3010_v20  ;;  %v3292_v46 = vshll.u32 %v525_v37, 16  ;;  %v3294_v47 = vshll.u32 %v526_v38, 16  ;;  %v3299_v49 = vshrl.u32 %v527_v40, 16  ;;  %v3304_v54 = vshll.u32 %v527_v40, 16 }
  0x1f   : > { %2786 = vmatprep.subr.bf16.mxu0 %v3011_v24  ;;  %v577_v51 = vrot.slane %v3278_v41, 7  ;;  %v581_v52 = vrot.slane %v3280_v42, 7  ;;  %v585_v53 = vrot.slane %v3282_v43, 7  ;;  %v2539_v10 = vunpack.c.h.bf16 %v2565_v4 }
  0x20   : > { %v589_v57 = vrot.slane %v3299_v49, 7  ;;  %v523_v21 = vpack.c.bf16 %v3351_v12, %v3351_v12  ;;  %v528_v38 = vpack.c.bf16 %v3372_v28, %v3372_v28  ;;  %v3388_v39 = vmax.f32 %v510_v29, 0.0 }
  0x21   : > { %2691 = vmatpush3.bf16.msra.mxu1 %v3010_v20  ;;  %v580_v58 = vor.u32 %v3284_v44, %v577_v51  ;;  %v584_v59 = vor.u32 %v3292_v46, %v581_v52  ;;  %v588_v60 = vor.u32 %v3294_v47, %v585_v53  ;;  %v492_v19 = vmul.f32 %v2539_v10, %v3223_v13  ;;  %v3020_v51 = vld [vmem:[%s3781_s5 + $0x18] sm:$0xff]   ;;  %v3023_v52 = vld [vmem:[%s3781_s5 + $0x1e0] sm:$0xff]  }
  0x22   : > { %2787 = vmatpush3.bf16.msra.mxu0 %v3011_v24  ;;  %2692 = vmatprep.subr.bf16.mxu1 %v3012_v30  ;;  %v592_v3 = vor.u32 %v3304_v54, %v589_v57  ;;  %v2543_v20 = vunpack.c.h.bf16 %v2566_v11  ;;  %v3367_v26 = vshrl.u32 %v523_v21, 16  ;;  %v3384_v37 = vshll.u32 %v523_v21, 16 }
  0x23   : > { %2788 = vmatprep.subr.bf16.mxu0 %v3013_v35  ;;  %v3325_v0 = vsel %vm3308_vm2, %v3278_v41, %v580_v58  ;;  %v3330_v1 = vsel %vm3308_vm2, %v3280_v42, %v584_v59  ;;  %v3335_v2 = vsel %vm3308_vm2, %v3282_v43, %v588_v60  ;;  %v509_v24 = vadd.f32 %v3231_v18, %v492_v19 }
  0x24   : > { %v2304_v6 = vcombine.low %v3325_v0, %v3330_v1  ;;  %v3345_v8 = vsel %vm3308_vm2, %v3299_v49, %v592_v3  ;;  %v494_v25 = vmul.f32 %v2543_v20, %v3223_v13  ;;  %v573_v40 = vrot.slane %v3367_v26, 7 }
  0x25   : > { %2693 = vmatpush3.bf16.msra.mxu1 %v3012_v30  ;;  %v2305_v14 = vcombine.low %v3335_v2, %v3345_v8  ;;  %v3021_v30 = vld [vmem:[%s3781_s5 + $0x1d8] sm:$0xff]   ;;  %v3403_v53 = vshrl.u32 %v528_v38, 16  ;;  %v3405_v55 = vshll.u32 %v528_v38, 16  ;;  %v530_v57 = vpack.c.bf16 %v3388_v39, %v3388_v39  ;;  %v468_v38 = vld [vmem:[%s434_s28] sm:$0xf] }
  0x26   : > { %2789 = vmatpush3.bf16.msra.mxu0 %v3013_v35  ;;  %2702 = vmatprep.subr.bf16.mxu1 %v3014_v45  ;;  %v3381_v35 = vmax.f32 %v509_v24, 0.0  ;;  %v511_v36 = vadd.f32 %v3231_v18, %v494_v25  ;;  %v3411_v58 = vpack.c.bf16 %v3256_v33, %v3254_v32  ;;  %v3022_v32 = vld [vmem:[%s3781_s5 + $0x20] sm:$0xff]   ;;  %v576_v5 = vor.u32 %v3384_v37, %v573_v40  ;;  %v3024_v25 = vld [vmem:[%s3781_s5 + $0x28] sm:$0xff]  }
  0x27   : > { %2798 = vmatprep.subr.bf16.mxu0 %v3015_v48  ;;  %2694 = vmatprep.mubr.bf16.mxu1 %v2304_v6  ;;  %v593_v33 = vrot.slane %v3403_v53, 7  ;;  %v3430_v3 = vshrl.u32 %v530_v57, 16  ;;  %v3432_v4 = vshll.u32 %v530_v57, 16  ;;  %v642_v10 = vrot.slane %v3294_v47, 1 }
  0x28   : > { %2695 = vmatmul.mubr.bf16.vlgmr.msra.gmra.mrb[0].mxu1 %v2305_v14  ;;  %v3395_v50 = vmax.f32 %v511_v36, 0.0  ;;  %v626_v21 = vsel %vm3308_vm2, %v3367_v26, %v576_v5  ;;  %v644_v24 = vrot.slane %v3304_v54, 1 }
  0x29   : > { %2791 = vmatmul.mubr.bf16.vlgmr.msra.gmra.mrb[0].mxu0 %v2524_v61  ;;  %2703 = vmatpush3.bf16.msra.mxu1 %v3014_v45  ;;  %v529_v45 = vpack.c.bf16 %v3381_v35, %v3381_v35  ;;  %v596_v11 = vor.u32 %v3405_v55, %v593_v33  ;;  %v601_v14 = vrot.slane %v3430_v3, 7 }
  0x2a   : > { %2799 = vmatpush3.bf16.msra.mxu0 %v3015_v48  ;;  %2704 = vmatprep.subr.bf16.mxu1 %v3016_v9  ;;  %v2525_v48 = vpack.c.bf16 %v3381_v35, %v3372_v28  ;;  %v531_v61 = vpack.c.bf16 %v3395_v50, %v3395_v50  ;;  %v2526_v62 = vpack.c.bf16 %v3395_v50, %v3388_v39 }
  0x2b   : > { %2800 = vmatprep.subr.bf16.mxu0 %v3017_v63  ;;  %v3417_v59 = vshrl.u32 %v529_v45, 16  ;;  %v3419_v60 = vshll.u32 %v529_v45, 16  ;;  %v3450_v19 = vsel %vm3308_vm2, %v3403_v53, %v596_v11  ;;  %v604_v20 = vor.u32 %v3432_v4, %v601_v14 }
  0x2c   : > { %2794 = vmatprep.mubr.bf16.mxu0 %v2525_v48  ;;  %v558_v7 = vshrl.u32 %v531_v61, 16  ;;  %v2316_v45 = vcombine.low %v626_v21, %v3325_v0  ;;  %v645_v57 = vor.u32 %v644_v24, %v3299_v49  ;;  %v3029_v0 = vld [vmem:[%s3781_s5 + $0x1f8] sm:$0xff]   ;;  %v638_v11 = vrot.slane %v3284_v44, 1 }
  0x2d   : > { %2705 = vmatpush3.bf16.msra.mxu1 %v3016_v9  ;;  %v597_v6 = vrot.slane %v3417_v59, 7  ;;  %v3436_v9 = vshll.u32 %v531_v61, 16  ;;  %v3474_v29 = vsel %vm3308_vm2, %v3430_v3, %v604_v20  ;;  %v3539_v14 = vpack.c.bf16 %v3372_v28, %v3259_v34 }
  0x2e   : > { %2801 = vmatpush3.bf16.msra.mxu0 %v3017_v63  ;;  %2706 = vmatprep.subr.bf16.mxu1 %v3018_v27  ;;  %v640_v63 = vrot.slane %v3292_v46, 1  ;;  %v3516_v33 = vsel %vm3498_vm5, %v645_v57, %v3304_v54  ;;  %v3031_v54 = vld [vmem:[%s3781_s5 + $0x80] sm:$0xff]   ;;  %v3553_v34 = vpack.c.bf16 %v3388_v39, %v3381_v35  ;;  %v639_v20 = vor.u32 %v638_v11, %v3278_v41  ;;  %v3035_v41 = vld [vmem:[%s3781_s5 + $0x90] sm:$0xff]   ;;  %v3044_v57 = vld [vmem:[%s3781_s5 + $0x1b8] sm:$0xff]  }
  0x2f   : > { %2802 = vmatprep.subr.bf16.mxu0 %v3019_v17  ;;  %v600_v16 = vor.u32 %v3419_v60, %v597_v6  ;;  %v652_v61 = vrot.slane %v3436_v9, 1  ;;  %v3053_v11 = vld [vmem:[%s3781_s5 + $0x158] sm:$0xff]  }
  0x30   : > { %v641_v40 = vor.u32 %v640_v63, %v3280_v42  ;;  %v3026_v42 = vld [vmem:[%s3781_s5 + $0x30] sm:$0xff]   ;;  %v3579_v35 = vsel %vm3498_vm5, %v639_v20, %v3284_v44  ;;  %v3037_v44 = vld [vmem:[%s3781_s5 + $0x98] sm:$0xff]  }
  0x31   : > { %2707 = vmatpush3.bf16.msra.mxu1 %v3018_v27  ;;  %2795 = vmatmul.mubr.bf16.gmra.mrb[4].mxu0 %v2526_v62  ;;  %v3462_v22 = vsel %vm3308_vm2, %v3417_v59, %v600_v16  ;;  %v653_v49 = vor.u32 %v652_v61, %v558_v7  ;;  %v648_v61 = vrot.slane %v3419_v60, 1  ;;  %v3061_v20 = vld [vmem:[%s3781_s5 + $0x178] sm:$0xff]  }
  0x32   : > { %2803 = vmatpush3.bf16.msra.mxu0 %v3019_v17  ;;  %2708 = vmatprep.subr.bf16.mxu1 %v3020_v51  ;;  %v605_v17 = vrot.slane %v558_v7, 7  ;;  %v2306_v27 = vcombine.low %v3450_v19, %v3462_v22 }
  0x33   : > { %2804 = vmatprep.subr.bf16.mxu0 %v3021_v30  ;;  %2814 = vmatprep.mubr.bf16.mxu0 %v3411_v58  ;;  %v3533_v6 = vsel %vm3498_vm5, %v653_v49, %v3436_v9  ;;  %v3046_v49 = vld [vmem:[%s3781_s5 + $0x40] sm:$0xff]  }
  0x34   : > { %v608_v23 = vor.u32 %v3436_v9, %v605_v17  ;;  %2698 = vmatprep.mubr.bf16.mxu1 %v2306_v27  ;;  %v2317_v9 = vcombine.low %v3330_v1, %v3335_v2  ;;  %v3033_v17 = vld [vmem:[%s3781_s5 + $0x88] sm:$0xff]   ;;  %v3563_v1 = vcombine.low %v3345_v8, %v3450_v19  ;;  %v2319_v27 = vcombine.low %v3462_v22, %v3474_v29  ;;  %v3038_v22 = vld [vmem:[%s3781_s5 + $0x1a0] sm:$0xff]  }
  0x35   : > { %2709 = vmatpush3.bf16.msra.mxu1 %v3020_v51  ;;  %v478_v51 = vunpack.c.l.bf16 %v468_v38  ;;  %v3032_v2 = vld [vmem:[%s3781_s5 + $0x188] sm:$0xff]  }
  0x36   : > { %2805 = vmatpush3.bf16.msra.mxu0 %v3021_v30  ;;  %2710 = vmatprep.subr.bf16.mxu1 %v3022_v32  ;;  %v3027_v30 = vld [vmem:[%s3781_s5 + $0x1f0] sm:$0xff]   ;;  %v3481_v36 = vsel %vm3308_vm2, %v558_v7, %v608_v23  ;;  %v3040_v38 = vld [vmem:[%s3781_s5 + $0x1a8] sm:$0xff]  }
  0x37   : > { %2806 = vmatprep.subr.bf16.mxu0 %v3023_v52  ;;  %v2307_v48 = vcombine.low %v3474_v29, %v3481_v36  ;;  %v495_v62 = vmul.f32 %v3223_v13, %v478_v51  ;;  %v3041_v29 = vld [vmem:[%s3781_s5 + $0xa8] sm:$0xff]   ;;  %v3045_v51 = vld [vmem:[%s3781_s5 + $0xb8] sm:$0xff]  }
  0x39   : > { %2711 = vmatpush3.bf16.msra.mxu1 %v3022_v32  ;;  %v512_v63 = vadd.f32 %v3231_v18, %v495_v62  ;;  %v3506_v32 = vsel %vm3498_vm5, %v641_v40, %v3292_v46  ;;  %v3028_v18 = vld [vmem:[%s3781_s5 + $0x38] sm:$0xff]   ;;  %v3043_v40 = vld [vmem:[%s3781_s5 + $0xb0] sm:$0xff]  }
  0x3a   : > { %2807 = vmatpush3.bf16.msra.mxu0 %v3023_v52  ;;  %v643_v52 = vor.u32 %v642_v10, %v3282_v43  ;;  %2712 = vmatprep.subr.bf16.mxu1 %v3024_v25  ;;  %v636_v10 = vrot.slane %v3384_v37, 1 }
  0x3b   : > { %2808 = vmatprep.subr.bf16.mxu0 %v3025_v15  ;;  %2699 = vmatmul.mubr.bf16.gmra.mrb[4].mxu1 %v2307_v48  ;;  %v522_v5 = vmax.f32 %v512_v63, 0.0  ;;  %v3042_v48 = vld [vmem:[%s3781_s5 + $0x1b0] sm:$0xff]   ;;  %v649_v63 = vor.u32 %v648_v61, %v3417_v59  ;;  %v3048_v59 = vld [vmem:[%s3781_s5 + $0x48] sm:$0xff]  }
  0x3c   : > { %2718 = vmatprep.mubr.bf16.mxu1 %v2316_v45  ;;  %v3511_v13 = vsel %vm3498_vm5, %v643_v52, %v3294_v47  ;;  %v637_v28 = vor.u32 %v636_v10, %v3367_v26  ;;  %v646_v45 = vrot.slane %v3405_v55, 1  ;;  %v3051_v10 = vld [vmem:[%s3781_s5 + $0x150] sm:$0xff]  }
  0x3d   : > { %2713 = vmatpush3.bf16.msra.mxu1 %v3024_v25  ;;  %v3523_v46 = vcombine.low %v3506_v32, %v3511_v13  ;;  %v2479_v47 = vcombine.low %v3511_v13, %v3516_v33  ;;  %v532_v7 = vpack.c.bf16 %v522_v5, %v522_v5  ;;  %v2527_v19 = vpack.c.bf16 %v522_v5, %v3395_v50  ;;  %v3036_v50 = vld [vmem:[%s3781_s5 + $0x198] sm:$0xff]   ;;  %v3049_v5 = vld [vmem:[%s3781_s5 + $0x148] sm:$0xff]  }
  0x3e   : > { %2809 = vmatpush3.bf16.msra.mxu0 %v3025_v15  ;;  %2714 = vmatprep.subr.bf16.mxu1 %v3026_v42  ;;  %v3030_v15 = vld [vmem:[%s3781_s5 + $0x180] sm:$0xff]   ;;  %v679_v8 = vsel %vm3498_vm5, %v637_v28, %v3384_v37  ;;  %v3034_v37 = vld [vmem:[%s3781_s5 + $0x190] sm:$0xff]   ;;  %v647_v52 = vor.u32 %v646_v45, %v3403_v53  ;;  %v3065_v13 = vld [vmem:[%s3781_s5 + $0x218] sm:$0xff]  }
  0x3f   : > { %2810 = vmatprep.subr.bf16.mxu0 %v3027_v30  ;;  %v3544_v16 = vshll.u32 %v532_v7, 16  ;;  %v3557_v21 = vshrl.u32 %v532_v7, 16  ;;  %v2450_v25 = vcombine.low %v679_v8, %v3579_v35  ;;  %v3058_v28 = vld [vmem:[%s3781_s5 + $0x70] sm:$0xff]  }
  0x40   : > { %v3635_v53 = vsel %vm3498_vm5, %v647_v52, %v3405_v55 }
  0x41   : > { %2715 = vmatpush3.bf16.msra.mxu1 %v3026_v42  ;;  %v654_v23 = vrot.slane %v3544_v16, 1  ;;  %v650_v42 = vrot.slane %v3432_v4, 1  ;;  %v609_v62 = vrot.slane %v3557_v21, 7  ;;  %v3648_v55 = vcombine.low %v3516_v33, %v3635_v53  ;;  %v3067_v33 = vld [vmem:[%s3781_s5 + $0x228] sm:$0xff]  }
  0x42   : > { %2811 = vmatpush3.bf16.msra.mxu0 %v3027_v30  ;;  %2716 = vmatprep.subr.bf16.mxu1 %v3028_v18  ;;  %v3039_v30 = vld [vmem:[%s3781_s5 + $0xa0] sm:$0xff]  }
  0x43   : > { %2812 = vmatprep.subr.bf16.mxu0 %v3029_v0  ;;  %v655_v26 = vor.u32 %v654_v23, %v3557_v21  ;;  %v3062_v23 = vld [vmem:[%s3781_s5 + $0x200] sm:$0xff]  }
  0x45   : > { %2717 = vmatpush3.bf16.msra.mxu1 %v3028_v18  ;;  %v688_v39 = vsel %vm3498_vm5, %v655_v26, %v3544_v16  ;;  %v651_v18 = vor.u32 %v650_v42, %v3430_v3  ;;  %v3658_v3 = vsel %vm3498_vm5, %v649_v63, %v3419_v60  ;;  %v3064_v26 = vld [vmem:[%s3781_s5 + $0x210] sm:$0xff]  }
  0x46   : > { %2813 = vmatpush3.bf16.msra.mxu0 %v3029_v0  ;;  %2726 = vmatprep.subr.bf16.mxu1 %v3030_v15  ;;  %v3587_v24 = vcombine.low %v3533_v6, %v688_v39  ;;  %v3047_v0 = vld [vmem:[%s3781_s5 + $0x140] sm:$0xff]  }
  0x47   : > { %2822 = vmatprep.subr.bf16.mxu0 %v3031_v54  ;;  %v3663_v7 = vsel %vm3498_vm5, %v651_v18, %v3432_v4  ;;  %v3050_v4 = vld [vmem:[%s3781_s5 + $0x50] sm:$0xff]  }
  0x48   : > { %2719 = vmatmul.mubr.bf16.vlgmr.msra.gmra.mrb[0].mxu1 %v2317_v9  ;;  %v3675_v43 = vcombine.low %v3658_v3, %v3663_v7 }
  0x49   : > { %2815 = vmatmul.mubr.bf16.vlgmr.msra.gmra.mrb[0].mxu0 %v3539_v14  ;;  %2727 = vmatpush3.bf16.msra.mxu1 %v3030_v15  ;;  %v2478_v15 = vcombine.low %v3579_v35, %v3506_v32  ;;  %v3059_v32 = vld [vmem:[%s3781_s5 + $0x170] sm:$0xff]  }
  0x4a   : > { %2823 = vmatpush3.bf16.msra.mxu0 %v3031_v54  ;;  %2818 = vmatprep.mubr.bf16.mxu0 %v3553_v34  ;;  %v612_v54 = vor.u32 %v3544_v16, %v609_v62  ;;  %v2519_v16 = vpack.c.bf16 %v3252_v31, %v3351_v12  ;;  %v3054_v31 = vld [vmem:[%s3781_s5 + $0x60] sm:$0xff]   ;;  %v3057_v12 = vld [vmem:[%s3781_s5 + $0x168] sm:$0xff]  }
  0x4b   : > { %2824 = vmatprep.subr.bf16.mxu0 %v3033_v17  ;;  %2722 = vmatprep.mubr.bf16.mxu1 %v3563_v1 }
  0x4c   : > { %2728 = vmatprep.subr.bf16.mxu1 %v3032_v2  ;;  %v635_v60 = vsel %vm3308_vm2, %v3557_v21, %v612_v54  ;;  %v3060_v21 = vld [vmem:[%s3781_s5 + $0x78] sm:$0xff]  }
  0x4d   : > { %2729 = vmatpush3.bf16.msra.mxu1 %v3032_v2  ;;  %v2344_v56 = vcombine.low %v3481_v36, %v635_v60  ;;  %v3056_v36 = vld [vmem:[%s3781_s5 + $0x68] sm:$0xff]   ;;  %v2480_v2 = vcombine.low %v3635_v53, %v3658_v3 }
  0x4e   : > { %2825 = vmatpush3.bf16.msra.mxu0 %v3033_v17  ;;  %2730 = vmatprep.subr.bf16.mxu1 %v3034_v37  ;;  %v3055_v17 = vld [vmem:[%s3781_s5 + $0x160] sm:$0xff]  }
  0x4f   : > { %2826 = vmatprep.subr.bf16.mxu0 %v3035_v41 }
  0x50   : > { %2723 = vmatmul.mubr.bf16.gmra.mrb[4].mxu1 %v2319_v27 }
  0x51   : > { %2819 = vmatmul.mubr.bf16.gmra.mrb[4].mxu0 %v2527_v19  ;;  %2731 = vmatpush3.bf16.msra.mxu1 %v3034_v37 }
  0x52   : > { %2827 = vmatpush3.bf16.msra.mxu0 %v3035_v41  ;;  %2838 = vmatprep.mubr.bf16.mxu0 %v2450_v25  ;;  %v2481_v41 = vcombine.low %v3663_v7, %v3533_v6 }
  0x53   : > { %2828 = vmatprep.subr.bf16.mxu0 %v3037_v44  ;;  %2742 = vmatprep.mubr.bf16.mxu1 %v2317_v9  ;;  %v3052_v9 = vld [vmem:[%s3781_s5 + $0x58] sm:$0xff]  }
  0x54   : > { %2732 = vmatprep.subr.bf16.mxu1 %v3036_v50 }
  0x55   : > { %2733 = vmatpush3.bf16.msra.mxu1 %v3036_v50 }
  0x56   : > { %2829 = vmatpush3.bf16.msra.mxu0 %v3037_v44  ;;  %2734 = vmatprep.subr.bf16.mxu1 %v3038_v22 }
  0x57   : > { %2830 = vmatprep.subr.bf16.mxu0 %v3039_v30 }
  0x59   : > { %2735 = vmatpush3.bf16.msra.mxu1 %v3038_v22 }
  0x5a   : > { %2831 = vmatpush3.bf16.msra.mxu0 %v3039_v30  ;;  %2736 = vmatprep.subr.bf16.mxu1 %v3040_v38 }
  0x5b   : > { %2832 = vmatprep.subr.bf16.mxu0 %v3041_v29 }
  0x5d   : > { %2737 = vmatpush3.bf16.msra.mxu1 %v3040_v38 }
  0x5e   : > { %2833 = vmatpush3.bf16.msra.mxu0 %v3041_v29  ;;  %2738 = vmatprep.subr.bf16.mxu1 %v3042_v48 }
  0x5f   : > { %2834 = vmatprep.subr.bf16.mxu0 %v3043_v40 }
  0x61   : > { %2739 = vmatpush3.bf16.msra.mxu1 %v3042_v48 }
  0x62   : > { %2835 = vmatpush3.bf16.msra.mxu0 %v3043_v40  ;;  %2740 = vmatprep.subr.bf16.mxu1 %v3044_v57 }
  0x63   : > { %2836 = vmatprep.subr.bf16.mxu0 %v3045_v51 }
  0x65   : > { %2741 = vmatpush3.bf16.msra.mxu1 %v3044_v57 }
  0x66   : > { %2837 = vmatpush3.bf16.msra.mxu0 %v3045_v51  ;;  %2750 = vmatprep.subr.bf16.mxu1 %v3046_v49 }
  0x67   : > { %2846 = vmatprep.subr.bf16.mxu0 %v3047_v0 }
  0x68   : > { %2743 = vmatmul.mubr.bf16.vlgmr.msra.gmra.mrb[0].mxu1 %v3563_v1  ;;  %v3063_v1 = vld [vmem:[%s3781_s5 + $0x208] sm:$0xff]  }
  0x69   : > { %2839 = vmatmul.mubr.bf16.vlgmr.msra.gmra.mrb[0].mxu0 %v3523_v46  ;;  %2751 = vmatpush3.bf16.msra.mxu1 %v3046_v49 }
  0x6a   : > { %2847 = vmatpush3.bf16.msra.mxu0 %v3047_v0  ;;  %2842 = vmatprep.mubr.bf16.mxu0 %v3648_v55 }
  0x6b   : > { %2848 = vmatprep.subr.bf16.mxu0 %v3049_v5  ;;  %2746 = vmatprep.mubr.bf16.mxu1 %v2319_v27 }
  0x6c   : > { %2752 = vmatprep.subr.bf16.mxu1 %v3048_v59 }
  0x6d   : > { %2753 = vmatpush3.bf16.msra.mxu1 %v3048_v59 }
  0x6e   : > { %2849 = vmatpush3.bf16.msra.mxu0 %v3049_v5  ;;  %2754 = vmatprep.subr.bf16.mxu1 %v3050_v4 }
  0x6f   : > { %2850 = vmatprep.subr.bf16.mxu0 %v3051_v10 }
  0x70   : > { %2747 = vmatmul.mubr.bf16.gmra.mrb[4].mxu1 %v2344_v56 }
  0x71   : > { %2843 = vmatmul.mubr.bf16.gmra.mrb[4].mxu0 %v3675_v43  ;;  %2755 = vmatpush3.bf16.msra.mxu1 %v3050_v4 }
  0x72   : > { %2851 = vmatpush3.bf16.msra.mxu0 %v3051_v10  ;;  %2862 = vmatprep.mubr.bf16.mxu0 %v2478_v15 }
  0x73   : > { %2852 = vmatprep.subr.bf16.mxu0 %v3053_v11  ;;  %2766 = vmatprep.mubr.bf16.mxu1 %v2519_v16 }
  0x74   : > { %2756 = vmatprep.subr.bf16.mxu1 %v3052_v9 }
  0x75   : > { %2757 = vmatpush3.bf16.msra.mxu1 %v3052_v9 }
  0x76   : > { %2853 = vmatpush3.bf16.msra.mxu0 %v3053_v11  ;;  %2758 = vmatprep.subr.bf16.mxu1 %v3054_v31 }
  0x77   : > { %2854 = vmatprep.subr.bf16.mxu0 %v3055_v17 }
  0x79   : > { %2759 = vmatpush3.bf16.msra.mxu1 %v3054_v31 }
  0x7a   : > { %2855 = vmatpush3.bf16.msra.mxu0 %v3055_v17  ;;  %2760 = vmatprep.subr.bf16.mxu1 %v3056_v36 }
  0x7b   : > { %2856 = vmatprep.subr.bf16.mxu0 %v3057_v12 }
  0x7d   : > { %2761 = vmatpush3.bf16.msra.mxu1 %v3056_v36 }
  0x7e   : > { %2857 = vmatpush3.bf16.msra.mxu0 %v3057_v12  ;;  %2762 = vmatprep.subr.bf16.mxu1 %v3058_v28 }
  0x7f   : > { %2858 = vmatprep.subr.bf16.mxu0 %v3059_v32 }
  0x81   : > { %2763 = vmatpush3.bf16.msra.mxu1 %v3058_v28 }
  0x82   : > { %2859 = vmatpush3.bf16.msra.mxu0 %v3059_v32  ;;  %2764 = vmatprep.subr.bf16.mxu1 %v3060_v21 }
  0x83   : > { %2860 = vmatprep.subr.bf16.mxu0 %v3061_v20 }
  0x85   : > { %2765 = vmatpush3.bf16.msra.mxu1 %v3060_v21 }
  0x86   : > { %2861 = vmatpush3.bf16.msra.mxu0 %v3061_v20  ;;  %2894 = vmatprep.subr.bf16.mxu1 %v3062_v23 }
  0x87   : > { %2870 = vmatprep.subr.bf16.mxu0 %v3062_v23 }
  0x88   : > { %2767 = vmatmul.mubr.bf16.vlgmr.msra.gmra.mrb[0].mxu1 %v3411_v58  ;;  %v3066_v58 = vld [vmem:[%s3781_s5 + $0x220] sm:$0xff]  }
  0x89   : > { %2863 = vmatmul.mubr.bf16.vlgmr.msra.gmra.mrb[0].mxu0 %v2479_v47  ;;  %2902 = vmatpush3.bf16.msra.mxu1 %v3062_v23  ;;  %v3069_v47 = vld [vmem:[%s3781_s5 + $0x238] sm:$0xff]  }
  0x8a   : > { %2871 = vmatpush3.bf16.msra.mxu0 %v3062_v23  ;;  %2866 = vmatprep.mubr.bf16.mxu0 %v2480_v2 }
  0x8b   : > { %2872 = vmatprep.subr.bf16.mxu0 %v3063_v1  ;;  %2770 = vmatprep.mubr.bf16.mxu1 %v3539_v14 }
  0x8c   : > { %2895 = vmatprep.subr.bf16.mxu1 %v3063_v1 }
  0x8d   : > { %2903 = vmatpush3.bf16.msra.mxu1 %v3063_v1 }
  0x8e   : > { %2873 = vmatpush3.bf16.msra.mxu0 %v3063_v1  ;;  %2896 = vmatprep.subr.bf16.mxu1 %v3064_v26 }
  0x8f   : > { %2874 = vmatprep.subr.bf16.mxu0 %v3064_v26 }
  0x90   : > { %2771 = vmatmul.mubr.bf16.gmra.mrb[4].mxu1 %v3553_v34 }
  0x91   : > { %2867 = vmatmul.mubr.bf16.gmra.mrb[4].mxu0 %v2481_v41  ;;  %2904 = vmatpush3.bf16.msra.mxu1 %v3064_v26 }
  0x92   : > { %2875 = vmatpush3.bf16.msra.mxu0 %v3064_v26  ;;  %2886 = vmatprep.mubr.bf16.mxu0 %v3523_v46  ;;  %v3068_v46 = vld [vmem:[%s3781_s5 + $0x230] sm:$0xff]  }
  0x93   : > { %2876 = vmatprep.subr.bf16.mxu0 %v3065_v13  ;;  %2890 = vmatprep.mubr.bf16.mxu1 %v3675_v43 }
  0x94   : > { %2897 = vmatprep.subr.bf16.mxu1 %v3065_v13 }
  0x95   : > { %2905 = vmatpush3.bf16.msra.mxu1 %v3065_v13 }
  0x96   : > { %2877 = vmatpush3.bf16.msra.mxu0 %v3065_v13  ;;  %2898 = vmatprep.subr.bf16.mxu1 %v3066_v58 }
  0x97   : > { %2878 = vmatprep.subr.bf16.mxu0 %v3066_v58 }
  0x99   : > { %2906 = vmatpush3.bf16.msra.mxu1 %v3066_v58 }
  0x9a   : > { %2879 = vmatpush3.bf16.msra.mxu0 %v3066_v58  ;;  %2899 = vmatprep.subr.bf16.mxu1 %v3067_v33 }
  0x9b   : > { %2880 = vmatprep.subr.bf16.mxu0 %v3067_v33 }
  0x9d   : > { %2907 = vmatpush3.bf16.msra.mxu1 %v3067_v33 }
  0x9e   : > { %2881 = vmatpush3.bf16.msra.mxu0 %v3067_v33  ;;  %2900 = vmatprep.subr.bf16.mxu1 %v3068_v46 }
  0x9f   : > { %2882 = vmatprep.subr.bf16.mxu0 %v3068_v46 }
  0xa1   : > { %2908 = vmatpush3.bf16.msra.mxu1 %v3068_v46 }
  0xa2   : > { %2883 = vmatpush3.bf16.msra.mxu0 %v3068_v46  ;;  %2901 = vmatprep.subr.bf16.mxu1 %v3069_v47 }
  0xa3   : > { %2884 = vmatprep.subr.bf16.mxu0 %v3069_v47 }
  0xa5   : > { %2909 = vmatpush3.bf16.msra.mxu1 %v3069_v47 }
  0xa6   : > { %2885 = vmatpush3.bf16.msra.mxu0 %v3069_v47 }
  0xa8   : > { %2891 = vmatmul.mubr.bf16.vlgmr.msra.gmra.mrb[8].mxu1 %v3587_v24 }
  0xa9   : > { %2887 = vmatmul.mubr.bf16.vlgmr.msra.gmra.mrb[0].mxu0 %v3648_v55 }
 0x15b   : > { %v2768_v6 = vpop.f32.mrb[0].mxu1 }
 0x15c   : > { %v1247_v14 = vpop.f32.mrb[1].mxu1 }
 0x15d   : > { %v2769_v34 = vpop.f32.mrb[2].mxu1 }
 0x15e   : > { %v1250_v8 = vpop.f32.mrb[3].mxu1 }
 0x163   : > { %v2772_v37 = vpop.f32.mrb[4].mxu1 }
 0x164   : > { %v2868_v35 = vpop.f32.mrb[4].mxu0  ;;  %v1263_v27 = vpop.f32.mrb[5].mxu1 }
 0x165   : > { %v1863_v39 = vpop.f32.mrb[5].mxu0  ;;  %v2914_v25 = vadd.f32 %v2868_v35, %v2772_v37  ;;  %v2773_v30 = vpop.f32.mrb[6].mxu1 }
 0x166   : > { %v2869_v19 = vpop.f32.mrb[6].mxu0  ;;  %v2916_v50 = vadd.f32 %v1863_v39, %v1263_v27  ;;  %v1266_v29 = vpop.f32.mrb[7].mxu1 }
 0x167   : > { %v1866_v44 = vpop.f32.mrb[7].mxu0  ;;  %v2918_v22 = vadd.f32 %v2869_v19, %v2773_v30 }
 0x168   : > { %v2920_v38 = vadd.f32 %v1866_v44, %v1266_v29 }
 0x17b   : > { %v2892_v52 = vpop.f32.mrb[8].mxu1 }
 0x17c   : > { %v2888_v40 = vpop.f32.mrb[0].mxu0  ;;  %v2915_v42 = vadd.f32 %v2914_v25, %v2892_v52  ;;  %v2005_v0 = vpop.f32.mrb[9].mxu1 }
 0x17d   : > { %v2910_v45 = vadd.f32 %v2888_v40, %v2768_v6  ;;  %v1989_v24 = vpop.f32.mrb[1].mxu0  ;;  %v2917_v62 = vadd.f32 %v2916_v50, %v2005_v0  ;;  %v2893_v63 = vpop.f32.mrb[10].mxu1 }
 0x17e   : > { %v2911_v48 = vadd.f32 %v1989_v24, %v1247_v14  ;;  %v2889_v51 = vpop.f32.mrb[2].mxu0  ;;  %v2919_v18 = vadd.f32 %v2918_v22, %v2893_v63  ;;  %v2008_v54 = vpop.f32.mrb[11].mxu1  ;;  %v2064_v20 = vmul.f32 %v2915_v42, %v2915_v42 }
 0x17f   : > { %v2912_v57 = vadd.f32 %v2889_v51, %v2769_v34  ;;  %v1992_v61 = vpop.f32.mrb[3].mxu0  ;;  %v2921_v7 = vadd.f32 %v2920_v38, %v2008_v54  ;;  %v2060_v43 = vmul.f32 %v2910_v45, %v2910_v45  ;;  %v2062_v17 = vmul.f32 %v2917_v62, %v2917_v62 }
 0x180   : > { %v2913_v53 = vadd.f32 %v1992_v61, %v1250_v8  ;;  %v2058_v59 = vmul.f32 %v2911_v48, %v2911_v48  ;;  %v2562_v10 = vpack.c.bf16 %v2919_v18, %v2915_v42  ;;  %v2065_v1 = vmul.f32 %v2919_v18, %v2919_v18 }
 0x181   : > { %v2552_v49 = vpack.c.bf16 %v2912_v57, %v2910_v45  ;;  %v2557_v11 = vpack.c.bf16 %v2921_v7, %v2917_v62  ;;  %v2061_v56 = vmul.f32 %v2912_v57, %v2912_v57  ;;  %v2063_v36 = vmul.f32 %v2921_v7, %v2921_v7 }
 0x182   : > { %v2547_v5 = vpack.c.bf16 %v2913_v53, %v2911_v48  ;;  %v2044_v55 = vadd.f32 %v2913_v53, %v2911_v48  ;;  %v2059_v3 = vmul.f32 %v2913_v53, %v2913_v53  ;;  %2569 = vst [vmem:[%s444_s16 + $0x18] sm:$0xff] %v2562_v10  }
 0x183   : > { %2567 = vst [vmem:[%s444_s16 + $0x8] sm:$0xff] %v2552_v49   ;;  %2568 = vst [vmem:[%s444_s16 + $0x10] sm:$0xff] %v2557_v11  }
 0x184   : > { %2548 = vst [vmem:[%s444_s16] sm:$0xff] %v2547_v5   ;;  %v2045_v60 = vadd.f32 %v2910_v45, %v2044_v55  ;;  %v2066_v4 = vadd.f32 %v2059_v3, %v2058_v59 }
 0x186   : > { %v2046_v15 = vadd.f32 %v2912_v57, %v2045_v60  ;;  %v2067_v16 = vadd.f32 %v2066_v4, %v2060_v43 }
 0x188   : > { %v2047_v9 = vadd.f32 %v2917_v62, %v2046_v15  ;;  %v2068_v31 = vadd.f32 %v2067_v16, %v2061_v56 }
 0x18a   : > { %v2048_v12 = vadd.f32 %v2921_v7, %v2047_v9  ;;  %v2069_v32 = vadd.f32 %v2068_v31, %v2062_v17 }
 0x18c   : > { %v2049_v28 = vadd.f32 %v2915_v42, %v2048_v12  ;;  %v2070_v21 = vadd.f32 %v2069_v32, %v2063_v36 }
 0x18e   : > { %v2050_v23 = vadd.f32 %v2919_v18, %v2049_v28  ;;  %v2071_v2 = vadd.f32 %v2070_v21, %v2064_v20 }
 0x190   : > { %v2051_v26 = vrot.slane %v2050_v23, 4  ;;  %v2072_v41 = vadd.f32 %v2071_v2, %v2065_v1 }
 0x192   : > { %v2052_v13 = vadd.f32 %v2051_v26, %v2050_v23  ;;  %v2073_v58 = vrot.slane %v2072_v41, 4 }
 0x194   : > { %v2053_v33 = vrot.slane %v2052_v13, 2  ;;  %v2074_v46 = vadd.f32 %v2073_v58, %v2072_v41 }
 0x196   : > { %v2054_v47 = vadd.f32 %v2053_v33, %v2052_v13  ;;  %v2075_v6 = vrot.slane %v2074_v46, 2 }
 0x198   : > { %v2055_v14 = vrot.slane %v2054_v47, 1  ;;  %v2076_v34 = vadd.f32 %v2075_v6, %v2074_v46 }
 0x19a   : > { %v2056_v8 = vadd.f32 %v2055_v14, %v2054_v47  ;;  %v2077_v35 = vrot.slane %v2076_v34, 1 }
 0x19c   : > { %2057 = vst [vmem:[%s451_s20] sm:$0x1] %v2056_v8  ;;  %v2078_v39 = vadd.f32 %v2077_v35, %v2076_v34 }
 0x19e   : > { %2079 = vst [vmem:[%s457_s29] sm:$0x1] %v2078_v39 }
 0x19f PF: > { %s23_s19 = sadd.s32 1, %s3092_s19   ;;  %s3791_s17 = smov %s3088_s18 }
 0x1a0   : > { %p20_p7 = scmp.ge.s32.totalorder %s23_s19, 4   ;;  %s3792_s18 = smov %s3794_s0 }
 0x1a2   :  { %22 = sbr.rel (!%p20_p7) target bundleno = 3 (0x3), region = 112 }

</bundles_post_ra>
